<compile_context>
chip_gen: v6e
topology: v6e:2x2x1
jax: 0.10.0
libtpu: 0.0.40
codegen_flags: <defaults>
</compile_context>

<pallas_src>
import functools

import jax
import jax.numpy as jnp
from jax.experimental import pallas as pl
from jax.experimental.pallas import tpu as pltpu


_TAPS = tuple((dy, dx) for dy in (-1, 0, 1) for dx in (-1, 0, 1))


def rdb_kernel(x_ref, cw_ref, cb_ref, lw_ref, lb_ref, mask_ref, out_ref,
               p_ref, f_ref, *, W, G0, G, C):
    lanes = x_ref.shape[1]                     # Nb * H * W: lane axis of every GEMM
    Kpad = p_ref.shape[0]

    # Hoist the 8 sublane-broadcast SAME-padding masks once per invocation (f32 {0,1});
    # reused by every scatter below instead of re-broadcasting per unrolled tap.
    masks = mask_ref[...]                      # (9, lanes)
    nmax = max(G0, G)
    mask_b = [None] * 9
    for t, (dy, dx) in enumerate(_TAPS):
        if (dy, dx) != (0, 0):
            mask_b[t] = jnp.broadcast_to(masks[t][None, :], (nmax, lanes))

    # Zero the im2col rows that later layers (and the Kpad padding) will cover, so every
    # dense layer runs one uniform (G, Kpad) @ (Kpad, lanes) GEMM with no lane-unaligned
    # weight slice.  Must happen before the first dot: those rows meet zero weight columns,
    # but 0 * uninitialized-VMEM could still be NaN on the first grid step.
    if Kpad > G0 * 9:
        p_ref[G0 * 9:, :] = jnp.zeros((Kpad - G0 * 9, lanes), jnp.bfloat16)

    def scatter_taps(y, nch, row0):
        # Append the 9 shifted+masked copies of y (nch, lanes) f32 to the bf16 im2col
        # buffer: row row0 + t*nch + l holds channel l of y shifted by tap t.
        for t, (dy, dx) in enumerate(_TAPS):
            s = dy * W + dx                    # flat spatial shift of this tap
            if s == 0:
                shifted = y                    # center tap: no shift, no mask
            else:
                shifted = pltpu.roll(y, shift=(-s) % lanes, axis=1)   # XLU lane rotation
                shifted = shifted * mask_b[t][:nch]   # zero SAME-padding / cross-image halo
            p_ref[row0 + t * nch:row0 + (t + 1) * nch, :] = shifted.astype(jnp.bfloat16)

    x = x_ref[...]                             # (G0, lanes) f32, lane-dense
    f_ref[0:G0, :] = x.astype(jnp.bfloat16)    # center (unshifted) features for the LFF
    scatter_taps(x, G0, 0)

    for c in range(C):                         # C dense conv3x3 + ReLU layers, one GEMM each
        Cin = G0 + c * G
        y = jnp.dot(cw_ref[c], p_ref[...],     # bf16 MXU, f32 accumulate
                    preferred_element_type=jnp.float32)
        y = jnp.maximum(y + cb_ref[c], 0.0)    # bias + ReLU in f32 (VPU)
        f_ref[Cin:Cin + G, :] = y.astype(jnp.bfloat16)
        if c + 1 < C:                          # the last layer only feeds the LFF
            scatter_taps(y, G, Cin * 9)

    # 1x1 LFF conv over all Ctot channels + residual (residual added in exact f32).
    lff = jnp.dot(lw_ref[...], f_ref[...], preferred_element_type=jnp.float32)
    out_ref[...] = lff + lb_ref[...] + x


def _choose_images_per_step(N, M, Kpad, Ctot, G0):
    """How many images to fold into the lane axis of each grid step."""
    # Per-image VMEM bill per step: bf16 P/F scratch + double-buffered f32 in/out blocks
    # + mask block.  Stay comfortably under the 32 MiB limit we request (v7x: 64 MiB VMEM).
    per_image = (Kpad * 2 + Ctot * 2 + 2 * 9 * 4 + 2 * 2 * G0 * 4) * M
    nb_vmem = max(1, (24 * 1024 * 1024) // per_image)
    # ~2048 lanes per step amortizes per-step overhead, MXU weight pushes, roll/store costs.
    nb = max(1, min(N, nb_vmem, max(1, 2048 // M)))
    # v7x has 2 TensorCores: prefer >= 2 "parallel" grid steps when each stays lane-dense.
    if N > 1 and (N + nb - 1) // nb == 1 and ((N + 1) // 2) * M >= 512:
        nb = (N + 1) // 2
    return nb


def rdb_forward(x, conv_w, conv_b, lff_wt, lff_bt, tap_masks, *, G0, G, C,
                images_per_step=None):
    """x: (N, G0, H, W) NCHW float32.  Returns (N, G0, H, W)."""
    N, _, H, W = x.shape
    M = H * W
    Ctot = G0 + C * G
    Kpad = conv_w.shape[-1]
    assert M % 128 == 0, "H*W must be a multiple of 128 (lane-dense blocks)"
    assert G0 % 8 == 0 and G % 8 == 0, "G0, G must be sublane-aligned (multiples of 8)"

    nb = images_per_step or _choose_images_per_step(N, M, Kpad, Ctot, G0)
    steps = (N + nb - 1) // nb
    Npad = steps * nb
    lanes = nb * M

    # Layout plumbing (outside the kernel): fold the batch into the lane axis.
    xf = x.reshape(N, G0, M)
    if Npad != N:
        xf = jnp.pad(xf, ((0, Npad - N), (0, 0), (0, 0)))
    x_l = jnp.transpose(xf, (1, 0, 2)).reshape(G0, Npad * M)      # (G0, Npad*H*W)
    masks_l = jnp.tile(tap_masks, (1, nb))                        # (9, lanes), one block

    flops = 0
    for c in range(C):
        flops += 2 * G * ((G0 + c * G) * 9) * M
    flops = N * (flops + 2 * G0 * Ctot * M)
    bytes_accessed = int(2 * N * G0 * M * 4 + conv_w.size * 2 + lff_wt.size * 2
                         + conv_b.size * 4 + lff_bt.size * 4 + tap_masks.size * 4)

    kernel = functools.partial(rdb_kernel, W=W, G0=G0, G=G, C=C)
    out = pl.pallas_call(
        kernel,
        out_shape=jax.ShapeDtypeStruct((G0, Npad * M), jnp.float32),
        grid_spec=pltpu.PrefetchScalarGridSpec(
            num_scalar_prefetch=0,
            grid=(steps,),
            in_specs=[
                pl.BlockSpec((G0, lanes), lambda s: (0, s)),      # x, lane-dense
                pl.BlockSpec((C, G, Kpad), lambda s: (0, 0, 0)),  # packed conv weights (bf16)
                pl.BlockSpec((C, G, 1), lambda s: (0, 0, 0)),     # conv biases (f32)
                pl.BlockSpec((G0, Ctot), lambda s: (0, 0)),       # LFF weight^T (bf16)
                pl.BlockSpec((G0, 1), lambda s: (0, 0)),          # LFF bias (f32)
                pl.BlockSpec((9, lanes), lambda s: (0, 0)),       # per-tap padding masks
            ],
            out_specs=pl.BlockSpec((G0, lanes), lambda s: (0, s)),
            scratch_shapes=[
                pltpu.VMEM((Kpad, lanes), jnp.bfloat16),   # P: incremental im2col rows
                pltpu.VMEM((Ctot, lanes), jnp.bfloat16),   # F: center features (LFF input)
            ],
        ),
        compiler_params=pltpu.CompilerParams(
            dimension_semantics=("parallel",),
            vmem_limit_bytes=32 * 1024 * 1024,
        ),
        cost_estimate=pl.CostEstimate(flops=flops, transcendentals=0,
                                      bytes_accessed=bytes_accessed),
    )(x_l, conv_w, conv_b, lff_wt, lff_bt, masks_l)

    out = jnp.transpose(out.reshape(G0, Npad, M), (1, 0, 2))[:N]
    return out.reshape(N, G0, H, W)


def init_params(key, G0, G, C):
    """HWIO conv weights matching the PyTorch module's Conv2d layers."""
    keys = jax.random.split(key, 2 * C + 2)
    conv_ws, conv_bs = [], []
    for c in range(C):
        Cin = G0 + c * G
        conv_ws.append(0.05 * jax.random.normal(keys[2 * c], (3, 3, Cin, G), jnp.float32))
        conv_bs.append(0.05 * jax.random.normal(keys[2 * c + 1], (G,), jnp.float32))
    Ctot = G0 + C * G
    lff_w = 0.05 * jax.random.normal(keys[-2], (Ctot, G0), jnp.float32)
    lff_b = 0.05 * jax.random.normal(keys[-1], (G0,), jnp.float32)
    return conv_ws, conv_bs, lff_w, lff_b


def pack_params(conv_ws, conv_bs, lff_w, lff_b, G0, G, C):
    """Repack to the kernel's transposed / fused-K bf16 layout.

    Per layer c, (3,3,Cin,G) HWIO -> (G, Cin*9) where column start*9 + t*L + l multiplies
    im2col row start*9 + t*L + l (chunk of L channels starting at `start`, tap t, channel
    l), zero-padded on the right to a single lane-aligned Kpad shared by all layers.
    """
    Kmax = (G0 + (C - 1) * G) * 9
    Kpad = ((Kmax + 127) // 128) * 128
    packed = []
    for c, w in enumerate(conv_ws):
        chunks = [(0, G0)] + [(G0 + j * G, G) for j in range(c)]
        cols = []
        for start, L in chunks:
            sub = w[:, :, start:start + L, :]                      # (3,3,L,G)
            cols.append(jnp.transpose(sub, (3, 0, 1, 2)).reshape(G, 9 * L))
        wk = jnp.concatenate(cols, axis=1)                         # (G, Cin*9)
        packed.append(jnp.pad(wk, ((0, 0), (0, Kpad - wk.shape[1]))))
    conv_w = jnp.stack(packed).astype(jnp.bfloat16)                # (C, G, Kpad)
    conv_b = jnp.stack(conv_bs)[:, :, None]                        # (C, G, 1) f32
    lff_wt = lff_w.T.astype(jnp.bfloat16)                          # (G0, Ctot)
    lff_bt = lff_b[:, None]                                        # (G0, 1) f32
    return conv_w, conv_b, lff_wt, lff_bt


def make_tap_masks(H, W):
    """(9, H*W) f32 {0,1}: validity of (h+dy, w+dx) per 3x3 tap (SAME zero padding)."""
    h = jnp.arange(H)[:, None]
    w = jnp.arange(W)[None, :]
    masks = []
    for dy, dx in _TAPS:
        valid = (h + dy >= 0) & (h + dy < H) & (w + dx >= 0) & (w + dx < W)
        masks.append(valid.astype(jnp.float32).reshape(H * W))
    return jnp.stack(masks)


def rdb_reference(x, conv_ws, conv_bs, lff_w, lff_b):
    """Pure-JAX NCHW reference matching the PyTorch RDB semantics."""
    feat = x
    for w, b in zip(conv_ws, conv_bs):
        y = jax.lax.conv_general_dilated(
            feat, w, window_strides=(1, 1), padding="SAME",
            dimension_numbers=("NCHW", "HWIO", "NCHW"))
        y = jax.nn.relu(y + b[None, :, None, None])
        feat = jnp.concatenate([feat, y], axis=1)                  # torch.cat((x, out), 1)
    lff = jax.lax.conv_general_dilated(
        feat, lff_w[None, None], window_strides=(1, 1), padding="SAME",
        dimension_numbers=("NCHW", "HWIO", "NCHW")) + lff_b[None, :, None, None]
    return lff + x


if __name__ == "__main__":
    # RDB(growRate0=8, growRate=8, nConvLayers=3) on a (4, 8, 16, 16) NCHW input.
    # Auto-tiling folds 2 images per grid step -> grid=(2,) "parallel", 512-lane GEMMs.
    N, H, W = 4, 16, 16
    G0, G, C = 8, 8, 3

    key = jax.random.PRNGKey(0)
    kx, kp = jax.random.split(key)
    x = jax.random.normal(kx, (N, G0, H, W), jnp.float32)

    conv_ws, conv_bs, lff_w, lff_b = init_params(kp, G0, G, C)
    conv_w, conv_b, lff_wt, lff_bt = pack_params(conv_ws, conv_bs, lff_w, lff_b, G0, G, C)
    tap_masks = make_tap_masks(H, W)

    out = rdb_forward(x, conv_w, conv_b, lff_wt, lff_bt, tap_masks, G0=G0, G=G, C=C)
    out = jax.block_until_ready(out)

    ref = jax.block_until_ready(rdb_reference(x, conv_ws, conv_bs, lff_w, lff_b))
    assert out.shape == (N, G0, H, W)
    err = float(jnp.max(jnp.abs(out - ref)))
    # bf16 MXU operands (per the perf review) -> relaxed tolerance vs the f32 reference.
    assert jnp.allclose(out, ref, atol=2e-2, rtol=2e-2), f"max abs err {err}"

    print("KERNEL_OK")
</pallas_src>

<mosaic_0001>
module attributes {stable_mosaic.version = 11 : i64} {
  func.func @rdb_kernel(%arg0: i32, %arg1: memref<8x512xf32, #tpu.memory_space<vmem>>, %arg2: memref<3x8x256xbf16, #tpu.memory_space<vmem>>, %arg3: memref<3x8x1xf32, #tpu.memory_space<vmem>>, %arg4: memref<8x32xbf16, #tpu.memory_space<vmem>>, %arg5: memref<8x1xf32, #tpu.memory_space<vmem>>, %arg6: memref<9x512xf32, #tpu.memory_space<vmem>>, %arg7: memref<8x512xf32, #tpu.memory_space<vmem>>, %arg8: memref<256x512xbf16, #tpu.memory_space<vmem>>, %arg9: memref<32x512xbf16, #tpu.memory_space<vmem>>) attributes {dimension_semantics = [#tpu.dimension_semantics<parallel>], iteration_bounds = array<i64: 2>, scalar_prefetch = 0 : i64, scratch_operands = 2 : i64, tpu.core_type = #tpu.core_type<tc>, window_params = [{transform_indices = @transform_0, window_bounds = array<i64: 8, 512>}, {pipeline_mode = #tpu.pipeline_mode<synchronous>, transform_indices = @transform_1, window_bounds = array<i64: 3, 8, 256>}, {pipeline_mode = #tpu.pipeline_mode<synchronous>, transform_indices = @transform_2, window_bounds = array<i64: 3, 8, 1>}, {pipeline_mode = #tpu.pipeline_mode<synchronous>, transform_indices = @transform_3, window_bounds = array<i64: 8, 32>}, {pipeline_mode = #tpu.pipeline_mode<synchronous>, transform_indices = @transform_4, window_bounds = array<i64: 8, 1>}, {pipeline_mode = #tpu.pipeline_mode<synchronous>, transform_indices = @transform_5, window_bounds = array<i64: 9, 512>}, {transform_indices = @transform_6, window_bounds = array<i64: 8, 512>}]} {
    %c0 = arith.constant 0 : index
    %c0_0 = arith.constant 0 : index
    %0 = vector.load %arg6[%c0, %c0_0] : memref<9x512xf32, #tpu.memory_space<vmem>>, vector<9x512xf32>
    %1 = vector.extract_strided_slice %0 {offsets = [0, 0], sizes = [1, 512], strides = [1, 1]} : vector<9x512xf32> to vector<1x512xf32>
    %2 = vector.shape_cast %1 : vector<1x512xf32> to vector<512xf32>
    %3 = vector.shape_cast %2 : vector<512xf32> to vector<1x512xf32>
    %4 = vector.shape_cast %3 : vector<1x512xf32> to vector<1x512xf32>
    %5 = vector.broadcast %4 : vector<1x512xf32> to vector<8x512xf32>
    %6 = vector.extract_strided_slice %0 {offsets = [1, 0], sizes = [1, 512], strides = [1, 1]} : vector<9x512xf32> to vector<1x512xf32>
    %7 = vector.shape_cast %6 : vector<1x512xf32> to vector<512xf32>
    %8 = vector.shape_cast %7 : vector<512xf32> to vector<1x512xf32>
    %9 = vector.shape_cast %8 : vector<1x512xf32> to vector<1x512xf32>
    %10 = vector.broadcast %9 : vector<1x512xf32> to vector<8x512xf32>
    %11 = vector.extract_strided_slice %0 {offsets = [2, 0], sizes = [1, 512], strides = [1, 1]} : vector<9x512xf32> to vector<1x512xf32>
    %12 = vector.shape_cast %11 : vector<1x512xf32> to vector<512xf32>
    %13 = vector.shape_cast %12 : vector<512xf32> to vector<1x512xf32>
    %14 = vector.shape_cast %13 : vector<1x512xf32> to vector<1x512xf32>
    %15 = vector.broadcast %14 : vector<1x512xf32> to vector<8x512xf32>
    %16 = vector.extract_strided_slice %0 {offsets = [3, 0], sizes = [1, 512], strides = [1, 1]} : vector<9x512xf32> to vector<1x512xf32>
    %17 = vector.shape_cast %16 : vector<1x512xf32> to vector<512xf32>
    %18 = vector.shape_cast %17 : vector<512xf32> to vector<1x512xf32>
    %19 = vector.shape_cast %18 : vector<1x512xf32> to vector<1x512xf32>
    %20 = vector.broadcast %19 : vector<1x512xf32> to vector<8x512xf32>
    %21 = vector.extract_strided_slice %0 {offsets = [5, 0], sizes = [1, 512], strides = [1, 1]} : vector<9x512xf32> to vector<1x512xf32>
    %22 = vector.shape_cast %21 : vector<1x512xf32> to vector<512xf32>
    %23 = vector.shape_cast %22 : vector<512xf32> to vector<1x512xf32>
    %24 = vector.shape_cast %23 : vector<1x512xf32> to vector<1x512xf32>
    %25 = vector.broadcast %24 : vector<1x512xf32> to vector<8x512xf32>
    %26 = vector.extract_strided_slice %0 {offsets = [6, 0], sizes = [1, 512], strides = [1, 1]} : vector<9x512xf32> to vector<1x512xf32>
    %27 = vector.shape_cast %26 : vector<1x512xf32> to vector<512xf32>
    %28 = vector.shape_cast %27 : vector<512xf32> to vector<1x512xf32>
    %29 = vector.shape_cast %28 : vector<1x512xf32> to vector<1x512xf32>
    %30 = vector.broadcast %29 : vector<1x512xf32> to vector<8x512xf32>
    %31 = vector.extract_strided_slice %0 {offsets = [7, 0], sizes = [1, 512], strides = [1, 1]} : vector<9x512xf32> to vector<1x512xf32>
    %32 = vector.shape_cast %31 : vector<1x512xf32> to vector<512xf32>
    %33 = vector.shape_cast %32 : vector<512xf32> to vector<1x512xf32>
    %34 = vector.shape_cast %33 : vector<1x512xf32> to vector<1x512xf32>
    %35 = vector.broadcast %34 : vector<1x512xf32> to vector<8x512xf32>
    %36 = vector.extract_strided_slice %0 {offsets = [8, 0], sizes = [1, 512], strides = [1, 1]} : vector<9x512xf32> to vector<1x512xf32>
    %37 = vector.shape_cast %36 : vector<1x512xf32> to vector<512xf32>
    %38 = vector.shape_cast %37 : vector<512xf32> to vector<1x512xf32>
    %39 = vector.shape_cast %38 : vector<1x512xf32> to vector<1x512xf32>
    %40 = vector.broadcast %39 : vector<1x512xf32> to vector<8x512xf32>
    %cst = arith.constant 0.000000e+00 : bf16
    %41 = vector.broadcast %cst : bf16 to vector<184x512xbf16>
    %c72 = arith.constant 72 : index
    %c0_1 = arith.constant 0 : index
    %42 = vector.load %arg8[%c72, %c0_1] : memref<256x512xbf16, #tpu.memory_space<vmem>>, vector<184x512xbf16>
    tpu.vector_store %arg8[%c72, %c0_1], %41 {strides = array<i32>} : memref<256x512xbf16, #tpu.memory_space<vmem>>, vector<184x512xbf16>,
    %c0_2 = arith.constant 0 : index
    %c0_3 = arith.constant 0 : index
    %43 = vector.load %arg1[%c0_2, %c0_3] : memref<8x512xf32, #tpu.memory_space<vmem>>, vector<8x512xf32>
    %44 = arith.truncf %43 : vector<8x512xf32> to vector<8x512xbf16>
    %c0_4 = arith.constant 0 : index
    %c0_5 = arith.constant 0 : index
    %45 = vector.load %arg9[%c0_4, %c0_5] : memref<32x512xbf16, #tpu.memory_space<vmem>>, vector<8x512xbf16>
    tpu.vector_store %arg9[%c0_4, %c0_5], %44 {strides = array<i32>} : memref<32x512xbf16, #tpu.memory_space<vmem>>, vector<8x512xbf16>,
    %c17_i32 = arith.constant 17 : i32
    %46 = tpu.dynamic_rotate %43 by %c17_i32 dim 1 : vector<8x512xf32>, i32 -> vector<8x512xf32>
    %47 = arith.mulf %46, %5 : vector<8x512xf32>
    %48 = arith.truncf %47 : vector<8x512xf32> to vector<8x512xbf16>
    %c0_6 = arith.constant 0 : index
    %c0_7 = arith.constant 0 : index
    %49 = vector.load %arg8[%c0_6, %c0_7] : memref<256x512xbf16, #tpu.memory_space<vmem>>, vector<8x512xbf16>
    tpu.vector_store %arg8[%c0_6, %c0_7], %48 {strides = array<i32>} : memref<256x512xbf16, #tpu.memory_space<vmem>>, vector<8x512xbf16>,
    %c16_i32 = arith.constant 16 : i32
    %50 = tpu.dynamic_rotate %43 by %c16_i32 dim 1 : vector<8x512xf32>, i32 -> vector<8x512xf32>
    %51 = arith.mulf %50, %10 : vector<8x512xf32>
    %52 = arith.truncf %51 : vector<8x512xf32> to vector<8x512xbf16>
    %c8 = arith.constant 8 : index
    %c0_8 = arith.constant 0 : index
    %53 = vector.load %arg8[%c8, %c0_8] : memref<256x512xbf16, #tpu.memory_space<vmem>>, vector<8x512xbf16>
    tpu.vector_store %arg8[%c8, %c0_8], %52 {strides = array<i32>} : memref<256x512xbf16, #tpu.memory_space<vmem>>, vector<8x512xbf16>,
    %c15_i32 = arith.constant 15 : i32
    %54 = tpu.dynamic_rotate %43 by %c15_i32 dim 1 : vector<8x512xf32>, i32 -> vector<8x512xf32>
    %55 = arith.mulf %54, %15 : vector<8x512xf32>
    %56 = arith.truncf %55 : vector<8x512xf32> to vector<8x512xbf16>
    %c16 = arith.constant 16 : index
    %c0_9 = arith.constant 0 : index
    %57 = vector.load %arg8[%c16, %c0_9] : memref<256x512xbf16, #tpu.memory_space<vmem>>, vector<8x512xbf16>
    tpu.vector_store %arg8[%c16, %c0_9], %56 {strides = array<i32>} : memref<256x512xbf16, #tpu.memory_space<vmem>>, vector<8x512xbf16>,
    %c1_i32 = arith.constant 1 : i32
    %58 = tpu.dynamic_rotate %43 by %c1_i32 dim 1 : vector<8x512xf32>, i32 -> vector<8x512xf32>
    %59 = arith.mulf %58, %20 : vector<8x512xf32>
    %60 = arith.truncf %59 : vector<8x512xf32> to vector<8x512xbf16>
    %c24 = arith.constant 24 : index
    %c0_10 = arith.constant 0 : index
    %61 = vector.load %arg8[%c24, %c0_10] : memref<256x512xbf16, #tpu.memory_space<vmem>>, vector<8x512xbf16>
    tpu.vector_store %arg8[%c24, %c0_10], %60 {strides = array<i32>} : memref<256x512xbf16, #tpu.memory_space<vmem>>, vector<8x512xbf16>,
    %62 = arith.truncf %43 : vector<8x512xf32> to vector<8x512xbf16>
    %c32 = arith.constant 32 : index
    %c0_11 = arith.constant 0 : index
    %63 = vector.load %arg8[%c32, %c0_11] : memref<256x512xbf16, #tpu.memory_space<vmem>>, vector<8x512xbf16>
    tpu.vector_store %arg8[%c32, %c0_11], %62 {strides = array<i32>} : memref<256x512xbf16, #tpu.memory_space<vmem>>, vector<8x512xbf16>,
    %c511_i32 = arith.constant 511 : i32
    %64 = tpu.dynamic_rotate %43 by %c511_i32 dim 1 : vector<8x512xf32>, i32 -> vector<8x512xf32>
    %65 = arith.mulf %64, %25 : vector<8x512xf32>
    %66 = arith.truncf %65 : vector<8x512xf32> to vector<8x512xbf16>
    %c40 = arith.constant 40 : index
    %c0_12 = arith.constant 0 : index
    %67 = vector.load %arg8[%c40, %c0_12] : memref<256x512xbf16, #tpu.memory_space<vmem>>, vector<8x512xbf16>
    tpu.vector_store %arg8[%c40, %c0_12], %66 {strides = array<i32>} : memref<256x512xbf16, #tpu.memory_space<vmem>>, vector<8x512xbf16>,
    %c497_i32 = arith.constant 497 : i32
    %68 = tpu.dynamic_rotate %43 by %c497_i32 dim 1 : vector<8x512xf32>, i32 -> vector<8x512xf32>
    %69 = arith.mulf %68, %30 : vector<8x512xf32>
    %70 = arith.truncf %69 : vector<8x512xf32> to vector<8x512xbf16>
    %c48 = arith.constant 48 : index
    %c0_13 = arith.constant 0 : index
    %71 = vector.load %arg8[%c48, %c0_13] : memref<256x512xbf16, #tpu.memory_space<vmem>>, vector<8x512xbf16>
    tpu.vector_store %arg8[%c48, %c0_13], %70 {strides = array<i32>} : memref<256x512xbf16, #tpu.memory_space<vmem>>, vector<8x512xbf16>,
    %c496_i32 = arith.constant 496 : i32
    %72 = tpu.dynamic_rotate %43 by %c496_i32 dim 1 : vector<8x512xf32>, i32 -> vector<8x512xf32>
    %73 = arith.mulf %72, %35 : vector<8x512xf32>
    %74 = arith.truncf %73 : vector<8x512xf32> to vector<8x512xbf16>
    %c56 = arith.constant 56 : index
    %c0_14 = arith.constant 0 : index
    %75 = vector.load %arg8[%c56, %c0_14] : memref<256x512xbf16, #tpu.memory_space<vmem>>, vector<8x512xbf16>
    tpu.vector_store %arg8[%c56, %c0_14], %74 {strides = array<i32>} : memref<256x512xbf16, #tpu.memory_space<vmem>>, vector<8x512xbf16>,
    %c495_i32 = arith.constant 495 : i32
    %76 = tpu.dynamic_rotate %43 by %c495_i32 dim 1 : vector<8x512xf32>, i32 -> vector<8x512xf32>
    %77 = arith.mulf %76, %40 : vector<8x512xf32>
    %78 = arith.truncf %77 : vector<8x512xf32> to vector<8x512xbf16>
    %c64 = arith.constant 64 : index
    %c0_15 = arith.constant 0 : index
    %79 = vector.load %arg8[%c64, %c0_15] : memref<256x512xbf16, #tpu.memory_space<vmem>>, vector<8x512xbf16>
    tpu.vector_store %arg8[%c64, %c0_15], %78 {strides = array<i32>} : memref<256x512xbf16, #tpu.memory_space<vmem>>, vector<8x512xbf16>,
    %c0_16 = arith.constant 0 : index
    %c0_17 = arith.constant 0 : index
    %c0_18 = arith.constant 0 : index
    %80 = vector.load %arg2[%c0_16, %c0_17, %c0_18] : memref<3x8x256xbf16, #tpu.memory_space<vmem>>, vector<1x8x256xbf16>
    %81 = vector.shape_cast %80 : vector<1x8x256xbf16> to vector<8x256xbf16>
    %c0_19 = arith.constant 0 : index
    %c0_20 = arith.constant 0 : index
    %82 = vector.load %arg8[%c0_19, %c0_20] : memref<256x512xbf16, #tpu.memory_space<vmem>>, vector<256x512xbf16>
    %cst_21 = arith.constant dense<0.000000e+00> : vector<8x512xf32>
    %83 = tpu.matmul %81, %82, %cst_21 {dimension_numbers = #tpu.dot_dimension_numbers<[1], [0], [0], [1], [0, 0, 1, 1], [], []>} : vector<8x256xbf16>, vector<256x512xbf16>, vector<8x512xf32> -> vector<8x512xf32>
    %c0_22 = arith.constant 0 : index
    %c0_23 = arith.constant 0 : index
    %c0_24 = arith.constant 0 : index
    %84 = vector.load %arg3[%c0_22, %c0_23, %c0_24] : memref<3x8x1xf32, #tpu.memory_space<vmem>>, vector<1x8x1xf32>
    %85 = vector.shape_cast %84 : vector<1x8x1xf32> to vector<8x1xf32>
    %86 = vector.broadcast %85 : vector<8x1xf32> to vector<8x512xf32>
    %87 = arith.addf %83, %86 : vector<8x512xf32>
    %cst_25 = arith.constant 0.000000e+00 : f32
    %88 = vector.broadcast %cst_25 : f32 to vector<8x512xf32>
    %89 = arith.maximumf %87, %88 : vector<8x512xf32>
    %90 = arith.truncf %89 : vector<8x512xf32> to vector<8x512xbf16>
    %c8_26 = arith.constant 8 : index
    %c0_27 = arith.constant 0 : index
    %91 = vector.load %arg9[%c8_26, %c0_27] : memref<32x512xbf16, #tpu.memory_space<vmem>>, vector<8x512xbf16>
    tpu.vector_store %arg9[%c8_26, %c0_27], %90 {strides = array<i32>} : memref<32x512xbf16, #tpu.memory_space<vmem>>, vector<8x512xbf16>,
    %c17_i32_28 = arith.constant 17 : i32
    %92 = tpu.dynamic_rotate %89 by %c17_i32_28 dim 1 : vector<8x512xf32>, i32 -> vector<8x512xf32>
    %93 = arith.mulf %92, %5 : vector<8x512xf32>
    %94 = arith.truncf %93 : vector<8x512xf32> to vector<8x512xbf16>
    %c72_29 = arith.constant 72 : index
    %c0_30 = arith.constant 0 : index
    %95 = vector.load %arg8[%c72_29, %c0_30] : memref<256x512xbf16, #tpu.memory_space<vmem>>, vector<8x512xbf16>
    tpu.vector_store %arg8[%c72_29, %c0_30], %94 {strides = array<i32>} : memref<256x512xbf16, #tpu.memory_space<vmem>>, vector<8x512xbf16>,
    %c16_i32_31 = arith.constant 16 : i32
    %96 = tpu.dynamic_rotate %89 by %c16_i32_31 dim 1 : vector<8x512xf32>, i32 -> vector<8x512xf32>
    %97 = arith.mulf %96, %10 : vector<8x512xf32>
    %98 = arith.truncf %97 : vector<8x512xf32> to vector<8x512xbf16>
    %c80 = arith.constant 80 : index
    %c0_32 = arith.constant 0 : index
    %99 = vector.load %arg8[%c80, %c0_32] : memref<256x512xbf16, #tpu.memory_space<vmem>>, vector<8x512xbf16>
    tpu.vector_store %arg8[%c80, %c0_32], %98 {strides = array<i32>} : memref<256x512xbf16, #tpu.memory_space<vmem>>, vector<8x512xbf16>,
    %c15_i32_33 = arith.constant 15 : i32
    %100 = tpu.dynamic_rotate %89 by %c15_i32_33 dim 1 : vector<8x512xf32>, i32 -> vector<8x512xf32>
    %101 = arith.mulf %100, %15 : vector<8x512xf32>
    %102 = arith.truncf %101 : vector<8x512xf32> to vector<8x512xbf16>
    %c88 = arith.constant 88 : index
    %c0_34 = arith.constant 0 : index
    %103 = vector.load %arg8[%c88, %c0_34] : memref<256x512xbf16, #tpu.memory_space<vmem>>, vector<8x512xbf16>
    tpu.vector_store %arg8[%c88, %c0_34], %102 {strides = array<i32>} : memref<256x512xbf16, #tpu.memory_space<vmem>>, vector<8x512xbf16>,
    %c1_i32_35 = arith.constant 1 : i32
    %104 = tpu.dynamic_rotate %89 by %c1_i32_35 dim 1 : vector<8x512xf32>, i32 -> vector<8x512xf32>
    %105 = arith.mulf %104, %20 : vector<8x512xf32>
    %106 = arith.truncf %105 : vector<8x512xf32> to vector<8x512xbf16>
    %c96 = arith.constant 96 : index
    %c0_36 = arith.constant 0 : index
    %107 = vector.load %arg8[%c96, %c0_36] : memref<256x512xbf16, #tpu.memory_space<vmem>>, vector<8x512xbf16>
    tpu.vector_store %arg8[%c96, %c0_36], %106 {strides = array<i32>} : memref<256x512xbf16, #tpu.memory_space<vmem>>, vector<8x512xbf16>,
    %108 = arith.truncf %89 : vector<8x512xf32> to vector<8x512xbf16>
    %c104 = arith.constant 104 : index
    %c0_37 = arith.constant 0 : index
    %109 = vector.load %arg8[%c104, %c0_37] : memref<256x512xbf16, #tpu.memory_space<vmem>>, vector<8x512xbf16>
    tpu.vector_store %arg8[%c104, %c0_37], %108 {strides = array<i32>} : memref<256x512xbf16, #tpu.memory_space<vmem>>, vector<8x512xbf16>,
    %c511_i32_38 = arith.constant 511 : i32
    %110 = tpu.dynamic_rotate %89 by %c511_i32_38 dim 1 : vector<8x512xf32>, i32 -> vector<8x512xf32>
    %111 = arith.mulf %110, %25 : vector<8x512xf32>
    %112 = arith.truncf %111 : vector<8x512xf32> to vector<8x512xbf16>
    %c112 = arith.constant 112 : index
    %c0_39 = arith.constant 0 : index
    %113 = vector.load %arg8[%c112, %c0_39] : memref<256x512xbf16, #tpu.memory_space<vmem>>, vector<8x512xbf16>
    tpu.vector_store %arg8[%c112, %c0_39], %112 {strides = array<i32>} : memref<256x512xbf16, #tpu.memory_space<vmem>>, vector<8x512xbf16>,
    %c497_i32_40 = arith.constant 497 : i32
    %114 = tpu.dynamic_rotate %89 by %c497_i32_40 dim 1 : vector<8x512xf32>, i32 -> vector<8x512xf32>
    %115 = arith.mulf %114, %30 : vector<8x512xf32>
    %116 = arith.truncf %115 : vector<8x512xf32> to vector<8x512xbf16>
    %c120 = arith.constant 120 : index
    %c0_41 = arith.constant 0 : index
    %117 = vector.load %arg8[%c120, %c0_41] : memref<256x512xbf16, #tpu.memory_space<vmem>>, vector<8x512xbf16>
    tpu.vector_store %arg8[%c120, %c0_41], %116 {strides = array<i32>} : memref<256x512xbf16, #tpu.memory_space<vmem>>, vector<8x512xbf16>,
    %c496_i32_42 = arith.constant 496 : i32
    %118 = tpu.dynamic_rotate %89 by %c496_i32_42 dim 1 : vector<8x512xf32>, i32 -> vector<8x512xf32>
    %119 = arith.mulf %118, %35 : vector<8x512xf32>
    %120 = arith.truncf %119 : vector<8x512xf32> to vector<8x512xbf16>
    %c128 = arith.constant 128 : index
    %c0_43 = arith.constant 0 : index
    %121 = vector.load %arg8[%c128, %c0_43] : memref<256x512xbf16, #tpu.memory_space<vmem>>, vector<8x512xbf16>
    tpu.vector_store %arg8[%c128, %c0_43], %120 {strides = array<i32>} : memref<256x512xbf16, #tpu.memory_space<vmem>>, vector<8x512xbf16>,
    %c495_i32_44 = arith.constant 495 : i32
    %122 = tpu.dynamic_rotate %89 by %c495_i32_44 dim 1 : vector<8x512xf32>, i32 -> vector<8x512xf32>
    %123 = arith.mulf %122, %40 : vector<8x512xf32>
    %124 = arith.truncf %123 : vector<8x512xf32> to vector<8x512xbf16>
    %c136 = arith.constant 136 : index
    %c0_45 = arith.constant 0 : index
    %125 = vector.load %arg8[%c136, %c0_45] : memref<256x512xbf16, #tpu.memory_space<vmem>>, vector<8x512xbf16>
    tpu.vector_store %arg8[%c136, %c0_45], %124 {strides = array<i32>} : memref<256x512xbf16, #tpu.memory_space<vmem>>, vector<8x512xbf16>,
    %c1 = arith.constant 1 : index
    %c0_46 = arith.constant 0 : index
    %c0_47 = arith.constant 0 : index
    %126 = vector.load %arg2[%c1, %c0_46, %c0_47] : memref<3x8x256xbf16, #tpu.memory_space<vmem>>, vector<1x8x256xbf16>
    %127 = vector.shape_cast %126 : vector<1x8x256xbf16> to vector<8x256xbf16>
    %c0_48 = arith.constant 0 : index
    %c0_49 = arith.constant 0 : index
    %128 = vector.load %arg8[%c0_48, %c0_49] : memref<256x512xbf16, #tpu.memory_space<vmem>>, vector<256x512xbf16>
    %cst_50 = arith.constant dense<0.000000e+00> : vector<8x512xf32>
    %129 = tpu.matmul %127, %128, %cst_50 {dimension_numbers = #tpu.dot_dimension_numbers<[1], [0], [0], [1], [0, 0, 1, 1], [], []>} : vector<8x256xbf16>, vector<256x512xbf16>, vector<8x512xf32> -> vector<8x512xf32>
    %c1_51 = arith.constant 1 : index
    %c0_52 = arith.constant 0 : index
    %c0_53 = arith.constant 0 : index
    %130 = vector.load %arg3[%c1_51, %c0_52, %c0_53] : memref<3x8x1xf32, #tpu.memory_space<vmem>>, vector<1x8x1xf32>
    %131 = vector.shape_cast %130 : vector<1x8x1xf32> to vector<8x1xf32>
    %132 = vector.broadcast %131 : vector<8x1xf32> to vector<8x512xf32>
    %133 = arith.addf %129, %132 : vector<8x512xf32>
    %cst_54 = arith.constant 0.000000e+00 : f32
    %134 = vector.broadcast %cst_54 : f32 to vector<8x512xf32>
    %135 = arith.maximumf %133, %134 : vector<8x512xf32>
    %136 = arith.truncf %135 : vector<8x512xf32> to vector<8x512xbf16>
    %c16_55 = arith.constant 16 : index
    %c0_56 = arith.constant 0 : index
    %137 = vector.load %arg9[%c16_55, %c0_56] : memref<32x512xbf16, #tpu.memory_space<vmem>>, vector<8x512xbf16>
    tpu.vector_store %arg9[%c16_55, %c0_56], %136 {strides = array<i32>} : memref<32x512xbf16, #tpu.memory_space<vmem>>, vector<8x512xbf16>,
    %c17_i32_57 = arith.constant 17 : i32
    %138 = tpu.dynamic_rotate %135 by %c17_i32_57 dim 1 : vector<8x512xf32>, i32 -> vector<8x512xf32>
    %139 = arith.mulf %138, %5 : vector<8x512xf32>
    %140 = arith.truncf %139 : vector<8x512xf32> to vector<8x512xbf16>
    %c144 = arith.constant 144 : index
    %c0_58 = arith.constant 0 : index
    %141 = vector.load %arg8[%c144, %c0_58] : memref<256x512xbf16, #tpu.memory_space<vmem>>, vector<8x512xbf16>
    tpu.vector_store %arg8[%c144, %c0_58], %140 {strides = array<i32>} : memref<256x512xbf16, #tpu.memory_space<vmem>>, vector<8x512xbf16>,
    %c16_i32_59 = arith.constant 16 : i32
    %142 = tpu.dynamic_rotate %135 by %c16_i32_59 dim 1 : vector<8x512xf32>, i32 -> vector<8x512xf32>
    %143 = arith.mulf %142, %10 : vector<8x512xf32>
    %144 = arith.truncf %143 : vector<8x512xf32> to vector<8x512xbf16>
    %c152 = arith.constant 152 : index
    %c0_60 = arith.constant 0 : index
    %145 = vector.load %arg8[%c152, %c0_60] : memref<256x512xbf16, #tpu.memory_space<vmem>>, vector<8x512xbf16>
    tpu.vector_store %arg8[%c152, %c0_60], %144 {strides = array<i32>} : memref<256x512xbf16, #tpu.memory_space<vmem>>, vector<8x512xbf16>,
    %c15_i32_61 = arith.constant 15 : i32
    %146 = tpu.dynamic_rotate %135 by %c15_i32_61 dim 1 : vector<8x512xf32>, i32 -> vector<8x512xf32>
    %147 = arith.mulf %146, %15 : vector<8x512xf32>
    %148 = arith.truncf %147 : vector<8x512xf32> to vector<8x512xbf16>
    %c160 = arith.constant 160 : index
    %c0_62 = arith.constant 0 : index
    %149 = vector.load %arg8[%c160, %c0_62] : memref<256x512xbf16, #tpu.memory_space<vmem>>, vector<8x512xbf16>
    tpu.vector_store %arg8[%c160, %c0_62], %148 {strides = array<i32>} : memref<256x512xbf16, #tpu.memory_space<vmem>>, vector<8x512xbf16>,
    %c1_i32_63 = arith.constant 1 : i32
    %150 = tpu.dynamic_rotate %135 by %c1_i32_63 dim 1 : vector<8x512xf32>, i32 -> vector<8x512xf32>
    %151 = arith.mulf %150, %20 : vector<8x512xf32>
    %152 = arith.truncf %151 : vector<8x512xf32> to vector<8x512xbf16>
    %c168 = arith.constant 168 : index
    %c0_64 = arith.constant 0 : index
    %153 = vector.load %arg8[%c168, %c0_64] : memref<256x512xbf16, #tpu.memory_space<vmem>>, vector<8x512xbf16>
    tpu.vector_store %arg8[%c168, %c0_64], %152 {strides = array<i32>} : memref<256x512xbf16, #tpu.memory_space<vmem>>, vector<8x512xbf16>,
    %154 = arith.truncf %135 : vector<8x512xf32> to vector<8x512xbf16>
    %c176 = arith.constant 176 : index
    %c0_65 = arith.constant 0 : index
    %155 = vector.load %arg8[%c176, %c0_65] : memref<256x512xbf16, #tpu.memory_space<vmem>>, vector<8x512xbf16>
    tpu.vector_store %arg8[%c176, %c0_65], %154 {strides = array<i32>} : memref<256x512xbf16, #tpu.memory_space<vmem>>, vector<8x512xbf16>,
    %c511_i32_66 = arith.constant 511 : i32
    %156 = tpu.dynamic_rotate %135 by %c511_i32_66 dim 1 : vector<8x512xf32>, i32 -> vector<8x512xf32>
    %157 = arith.mulf %156, %25 : vector<8x512xf32>
    %158 = arith.truncf %157 : vector<8x512xf32> to vector<8x512xbf16>
    %c184 = arith.constant 184 : index
    %c0_67 = arith.constant 0 : index
    %159 = vector.load %arg8[%c184, %c0_67] : memref<256x512xbf16, #tpu.memory_space<vmem>>, vector<8x512xbf16>
    tpu.vector_store %arg8[%c184, %c0_67], %158 {strides = array<i32>} : memref<256x512xbf16, #tpu.memory_space<vmem>>, vector<8x512xbf16>,
    %c497_i32_68 = arith.constant 497 : i32
    %160 = tpu.dynamic_rotate %135 by %c497_i32_68 dim 1 : vector<8x512xf32>, i32 -> vector<8x512xf32>
    %161 = arith.mulf %160, %30 : vector<8x512xf32>
    %162 = arith.truncf %161 : vector<8x512xf32> to vector<8x512xbf16>
    %c192 = arith.constant 192 : index
    %c0_69 = arith.constant 0 : index
    %163 = vector.load %arg8[%c192, %c0_69] : memref<256x512xbf16, #tpu.memory_space<vmem>>, vector<8x512xbf16>
    tpu.vector_store %arg8[%c192, %c0_69], %162 {strides = array<i32>} : memref<256x512xbf16, #tpu.memory_space<vmem>>, vector<8x512xbf16>,
    %c496_i32_70 = arith.constant 496 : i32
    %164 = tpu.dynamic_rotate %135 by %c496_i32_70 dim 1 : vector<8x512xf32>, i32 -> vector<8x512xf32>
    %165 = arith.mulf %164, %35 : vector<8x512xf32>
    %166 = arith.truncf %165 : vector<8x512xf32> to vector<8x512xbf16>
    %c200 = arith.constant 200 : index
    %c0_71 = arith.constant 0 : index
    %167 = vector.load %arg8[%c200, %c0_71] : memref<256x512xbf16, #tpu.memory_space<vmem>>, vector<8x512xbf16>
    tpu.vector_store %arg8[%c200, %c0_71], %166 {strides = array<i32>} : memref<256x512xbf16, #tpu.memory_space<vmem>>, vector<8x512xbf16>,
    %c495_i32_72 = arith.constant 495 : i32
    %168 = tpu.dynamic_rotate %135 by %c495_i32_72 dim 1 : vector<8x512xf32>, i32 -> vector<8x512xf32>
    %169 = arith.mulf %168, %40 : vector<8x512xf32>
    %170 = arith.truncf %169 : vector<8x512xf32> to vector<8x512xbf16>
    %c208 = arith.constant 208 : index
    %c0_73 = arith.constant 0 : index
    %171 = vector.load %arg8[%c208, %c0_73] : memref<256x512xbf16, #tpu.memory_space<vmem>>, vector<8x512xbf16>
    tpu.vector_store %arg8[%c208, %c0_73], %170 {strides = array<i32>} : memref<256x512xbf16, #tpu.memory_space<vmem>>, vector<8x512xbf16>,
    %c2 = arith.constant 2 : index
    %c0_74 = arith.constant 0 : index
    %c0_75 = arith.constant 0 : index
    %172 = vector.load %arg2[%c2, %c0_74, %c0_75] : memref<3x8x256xbf16, #tpu.memory_space<vmem>>, vector<1x8x256xbf16>
    %173 = vector.shape_cast %172 : vector<1x8x256xbf16> to vector<8x256xbf16>
    %c0_76 = arith.constant 0 : index
    %c0_77 = arith.constant 0 : index
    %174 = vector.load %arg8[%c0_76, %c0_77] : memref<256x512xbf16, #tpu.memory_space<vmem>>, vector<256x512xbf16>
    %cst_78 = arith.constant dense<0.000000e+00> : vector<8x512xf32>
    %175 = tpu.matmul %173, %174, %cst_78 {dimension_numbers = #tpu.dot_dimension_numbers<[1], [0], [0], [1], [0, 0, 1, 1], [], []>} : vector<8x256xbf16>, vector<256x512xbf16>, vector<8x512xf32> -> vector<8x512xf32>
    %c2_79 = arith.constant 2 : index
    %c0_80 = arith.constant 0 : index
    %c0_81 = arith.constant 0 : index
    %176 = vector.load %arg3[%c2_79, %c0_80, %c0_81] : memref<3x8x1xf32, #tpu.memory_space<vmem>>, vector<1x8x1xf32>
    %177 = vector.shape_cast %176 : vector<1x8x1xf32> to vector<8x1xf32>
    %178 = vector.broadcast %177 : vector<8x1xf32> to vector<8x512xf32>
    %179 = arith.addf %175, %178 : vector<8x512xf32>
    %cst_82 = arith.constant 0.000000e+00 : f32
    %180 = vector.broadcast %cst_82 : f32 to vector<8x512xf32>
    %181 = arith.maximumf %179, %180 : vector<8x512xf32>
    %182 = arith.truncf %181 : vector<8x512xf32> to vector<8x512xbf16>
    %c24_83 = arith.constant 24 : index
    %c0_84 = arith.constant 0 : index
    %183 = vector.load %arg9[%c24_83, %c0_84] : memref<32x512xbf16, #tpu.memory_space<vmem>>, vector<8x512xbf16>
    tpu.vector_store %arg9[%c24_83, %c0_84], %182 {strides = array<i32>} : memref<32x512xbf16, #tpu.memory_space<vmem>>, vector<8x512xbf16>,
    %c0_85 = arith.constant 0 : index
    %c0_86 = arith.constant 0 : index
    %184 = vector.load %arg4[%c0_85, %c0_86] : memref<8x32xbf16, #tpu.memory_space<vmem>>, vector<8x32xbf16>
    %c0_87 = arith.constant 0 : index
    %c0_88 = arith.constant 0 : index
    %185 = vector.load %arg9[%c0_87, %c0_88] : memref<32x512xbf16, #tpu.memory_space<vmem>>, vector<32x512xbf16>
    %cst_89 = arith.constant dense<0.000000e+00> : vector<8x512xf32>
    %186 = tpu.matmul %184, %185, %cst_89 {dimension_numbers = #tpu.dot_dimension_numbers<[1], [0], [0], [1], [0, 0, 1, 1], [], []>} : vector<8x32xbf16>, vector<32x512xbf16>, vector<8x512xf32> -> vector<8x512xf32>
    %c0_90 = arith.constant 0 : index
    %c0_91 = arith.constant 0 : index
    %187 = vector.load %arg5[%c0_90, %c0_91] : memref<8x1xf32, #tpu.memory_space<vmem>>, vector<8x1xf32>
    %188 = vector.broadcast %187 : vector<8x1xf32> to vector<8x512xf32>
    %189 = arith.addf %186, %188 : vector<8x512xf32>
    %190 = arith.addf %189, %43 : vector<8x512xf32>
    %c0_92 = arith.constant 0 : index
    %c0_93 = arith.constant 0 : index
    %191 = vector.load %arg7[%c0_92, %c0_93] : memref<8x512xf32, #tpu.memory_space<vmem>>, vector<8x512xf32>
    tpu.vector_store %arg7[%c0_92, %c0_93], %190 {strides = array<i32>} : memref<8x512xf32, #tpu.memory_space<vmem>>, vector<8x512xf32>,
    return
  }
  func.func @transform_0(%arg0: i32) -> (i32, i32) {
    %c0_i32 = arith.constant 0 : i32
    %c0_i32_0 = arith.constant 0 : i32
    return %c0_i32, %arg0 : i32, i32
  }
  func.func @transform_1(%arg0: i32) -> (i32, i32, i32) {
    %c0_i32 = arith.constant 0 : i32
    %c0_i32_0 = arith.constant 0 : i32
    %c0_i32_1 = arith.constant 0 : i32
    %c0_i32_2 = arith.constant 0 : i32
    return %c0_i32, %c0_i32_0, %c0_i32_1 : i32, i32, i32
  }
  func.func @transform_2(%arg0: i32) -> (i32, i32, i32) {
    %c0_i32 = arith.constant 0 : i32
    %c0_i32_0 = arith.constant 0 : i32
    %c0_i32_1 = arith.constant 0 : i32
    %c0_i32_2 = arith.constant 0 : i32
    return %c0_i32, %c0_i32_0, %c0_i32_1 : i32, i32, i32
  }
  func.func @transform_3(%arg0: i32) -> (i32, i32) {
    %c0_i32 = arith.constant 0 : i32
    %c0_i32_0 = arith.constant 0 : i32
    %c0_i32_1 = arith.constant 0 : i32
    return %c0_i32, %c0_i32_0 : i32, i32
  }
  func.func @transform_4(%arg0: i32) -> (i32, i32) {
    %c0_i32 = arith.constant 0 : i32
    %c0_i32_0 = arith.constant 0 : i32
    %c0_i32_1 = arith.constant 0 : i32
    return %c0_i32, %c0_i32_0 : i32, i32
  }
  func.func @transform_5(%arg0: i32) -> (i32, i32) {
    %c0_i32 = arith.constant 0 : i32
    %c0_i32_0 = arith.constant 0 : i32
    %c0_i32_1 = arith.constant 0 : i32
    return %c0_i32, %c0_i32_0 : i32, i32
  }
  func.func @transform_6(%arg0: i32) -> (i32, i32) {
    %c0_i32 = arith.constant 0 : i32
    %c0_i32_0 = arith.constant 0 : i32
    return %c0_i32, %arg0 : i32, i32
  }
}

</mosaic_0001>

<bundles_post_ra>
// kernel: tpu_custom_call.1
= control target key start
LH: loop header
LB: loop body
LE: loop exit
PB: predicated region body
PF: predicated region fallthrough
CT: control target
= control target key end

     0   :  { %s4876_s0 = inlined_call_operand.hbm [shape: f32[8,1024], index: 0, kind: input, shape index: {}]   ;;  %s4877_s1 = inlined_call_operand.vmem [shape: bf16[3,8,256], index: 1, kind: input, shape index: {}]   ;;  %s4878_s2 = inlined_call_operand.vmem [shape: f32[3,8,1], index: 2, kind: input, shape index: {}]   ;;  %s4879_s3 = inlined_call_operand.vmem [shape: bf16[8,32], index: 3, kind: input, shape index: {}]   ;;  %s4880_s4 = inlined_call_operand.vmem [shape: f32[8,1], index: 4, kind: input, shape index: {}]   ;;  %s4881_s5 = inlined_call_operand.hbm [shape: f32[9,512], index: 5, kind: input, shape index: {}]   ;;  %s4882_s6 = inlined_call_operand.hbm [shape: f32[8,1024], index: 6, kind: output, shape index: {}]  }
   0x1   :  { %4938 = sst [smem:[#allocation51_spill]] %s4881_s5 }
   0x2   :  { %11 = vsyncpa [#allocation5], 0 }
   0x3   :  { %13 = vsyncpa [#allocation5 + $0x1], 0 }
   0x4   :  { %14 = vsyncpa [#allocation8], 0 }
   0x5   :  { %15 = vsyncpa [#allocation6], 0 }
   0x6   :  { %17 = vsyncpa [#allocation6 + $0x1], 0  ;;  %s3739_s21 = smov 0   ;;  %s3741_s22 = smov 0  }
   0x7   :  { %s3743_s23 = smov 0   ;;  %s3745_s24 = smov 0  }
   0x8 LB: > { %s3760_s25 = sadd.s32 4294967295, %s3688_s24   ;;  %s3076_s26 = sadd.s32 4294967294, %s3688_s24   ;;  %s3688_s24 = sphi %s3745_s24, %s5034_s24   ;;  %s3684_s23 = sphi %s3743_s23, %s5033_s23   ;;  %s3680_s22 = sphi %s3741_s22, %s5032_s22   ;;  %s3676_s21 = sphi %s3739_s21, %s5031_s21  }
   0x9   : > { %p43_p0 = scmp.ne.s32.totalorder %s3680_s22, %s3676_s21  ;;  %p4883_p1 = scmp.eq.s32.totalorder %s3760_s25, 0 }
   0xa   : > { %p178_p3 = scmp.eq.s32.totalorder %s3076_s26, 1  ;;  %p3077_p5 = scmp.ge.s32.totalorder %s3688_s24, 1 }
   0xb   : > { %p3769_p4 = por %p4883_p1, %p43_p0  ;;  %p185_p7 = scmp.lt.s32.totalorder %s3688_s24, 3 }
   0xc   : > { %p3774_p6 = por %p178_p3, %p43_p0  ;;  %s3690_s30 = smov [#allocation7]  }
   0xd   : > { %s4939_s27 = scalar_select %p3769_p4, 1, 0 }
   0xe   : > { %s4940_s28 = scalar_select %p3774_p6, 1, 0 }
   0xf   : > { %p3779_p8 = pnand %p3077_p5, %p185_p7  ;;  %s209_s7 = sshll.u32 %s3690_s30, 4  ;;  %s210_s7 = int_to_ptr.vmem [resolvable:$true] %s209_s7 }
  0x10   : > { %s3793_s9 = sadd.s32 1, %s3688_s24   ;;  %s30_s10 = sadd.s32 1, %s3684_s23 }
  0x11   : > { %s4941_s29 = scalar_select %p3779_p8, 1, 0 }
  0x12   : > { %p3490_p9 = pneg %p3779_p8  ;;  %s27_s11 = ssub.s32 %s3688_s24, %s3793_s9 }
  0x13   : > { %s3577_s12 = scalar_lea.vmem %s210_s7, 1024  ;;  %p3585_p5 = scmp.lt.s32.totalorder %s210_s7, %s210_s7 }
  0x14   : > { %p3788_p11 = pnand %p3490_p9, %p4883_p1  ;;  %p3578_p13 = scmp.ne.s32.totalorder %s210_s7, %s3577_s12 }
  0x15   : > { %p3586_p7 = scmp.lt.s32.totalorder %s3577_s12, %s3577_s12 }
  0x16   : > { %p3568_p12 = pneg %p3788_p11 }
  0x17   : > { %p3587_p10 = por %p3586_p7, %p3585_p5 }
  0x18   : > { %p3580_p0 = pnand %p3578_p13, %p3568_p12 }
  0x1a   : > { %p3581_p3 = pneg %p3580_p0 }
  0x1c   : > { %p3588_p2 = pnand %p3587_p10, %p3581_p3 }
  0x1e   : > { %3591 = shalt.err (!%p3588_p2)
}
  0x1f   : > { %s3691_s13 = smov 512   ;;  %s3692_s14 = smov 32  }
  0x20   : > { %s4943_s5 = sld [smem:[#allocation51_spill]]  ;;  %p28_p9 = scmp.eq.s32.totalorder %s27_s11, 0 }
  0x21   : > { %p37_p12 = scmp.ne.s32.totalorder %s3684_s23, %s3680_s22  ;;  %p38_p10 = scmp.eq.s32.totalorder %s3688_s24, 0 }
  0x22   : > { %p3503_p2 = scmp.lt.s32.totalorder %s3688_s24, 2  ;;  %p4944_p0 = scmp.eq.s32.totalorder %s3760_s25, 1 }
  0x23   : > { %s3810_s17 = scalar_select %p28_p9, %s3684_s23, %s30_s10  }
  0x24   : > { %p39_p13 = por %p38_p10, %p37_p12  ;;  %p3814_p3 = por %p4944_p0, %p37_p12 }
  0x25   : > { %s223_s19 = sand.u32 1, %s3684_s23   ;;  %s3364_s20 = sshll.u32 %s3688_s24, 9 }
  0x26   : > { %3493 = dma.hbm_to_vmem [thread:$0]  (!%p3788_p11), %s4943_s5, 1024, %s210_s7, [#allocation8], %s3691_s13, %s3691_s13, %s3692_s14  }
  0x27   : > { %s4945_s18 = scalar_select %p3814_p3, 1, 0 }
  0x28   : > { %s3080_s26 = sshll.u32 %s223_s19, 5  ;;  %s3823_s12 = scalar_lea.hbm %s4876_s0, %s3364_s20 }
  0x29   : > { %s227_s7 = scalar_lea.vmem [#allocation4], %s3080_s26  ;;  %p3825_p11 = pnand %p3503_p2, %p39_p13 }
  0x2a   : > { %s235_s10 = sshll.u32 %s227_s7, 4  ;;  %s224_s13 = scalar_lea.sflag [#allocation5], %s223_s19  ;;  %s236_s10 = int_to_ptr.vmem [resolvable:$true] %s235_s10 }
  0x2b   : > { %s3592_s14 = scalar_lea.hbm %s3823_s12, 512  ;;  %p3594_p7 = pneg %p3825_p11 }
  0x2c   : > { %p3593_p5 = scmp.ne.s32.totalorder %s3823_s12, %s3592_s14  ;;  %s3597_s20 = scalar_lea.hbm %s4876_s0, 1024 }
  0x2d   : > { %p3598_p10 = scmp.lt.s32.totalorder %s3823_s12, %s4876_s0  ;;  %p3599_p2 = scmp.lt.s32.totalorder %s3597_s20, %s3592_s14 }
  0x2e   : > { %p3595_p9 = pnand %p3594_p7, %p3593_p5 }
  0x2f   : > { %p3600_p13 = por %p3599_p2, %p3598_p10 }
  0x30   : > { %p3596_p12 = pneg %p3595_p9 }
  0x32   : > { %p3601_p0 = pnand %p3600_p13, %p3596_p12 }
  0x34   : > { %3604 = shalt.err (!%p3601_p0)
}
  0x35   : > { %s3605_s8 = scalar_lea.vmem %s236_s10, 512  ;;  %s3693_s19 = smov [#allocation4]  }
  0x36   : > { %p3606_p1 = scmp.ne.s32.totalorder %s236_s10, %s3605_s8  ;;  %s3610_s7 = sshll.u32 %s3693_s19, 4  ;;  %s3611_s7 = int_to_ptr.vmem [resolvable:$false] %s3610_s7 }
  0x37   : > { %s3612_s5 = scalar_lea.vmem %s3611_s7, 1024  ;;  %p3613_p5 = scmp.lt.s32.totalorder %s236_s10, %s3611_s7 }
  0x38   : > { %p3608_p6 = pnand %p3606_p1, %p3594_p7  ;;  %p3614_p9 = scmp.lt.s32.totalorder %s3612_s5, %s3605_s8 }
  0x3a   : > { %p3609_p3 = pneg %p3608_p6  ;;  %p3615_p4 = por %p3614_p9, %p3613_p5 }
  0x3c   : > { %p3616_p8 = pnand %p3615_p4, %p3609_p3 }
  0x3e   : > { %3619 = shalt.err (!%p3616_p8)
}
  0x3f   : > { %3497 = dma.hbm_to_vmem [thread:$0]  (!%p3825_p11), %s3823_s12, 512, %s236_s10, %s224_s13  }
  0x40   : > { %p4947_p12 = scmp.ne.s32.totalorder %s4941_s29, 0 }
  0x42   : > { %244 = sbr.rel (%p4947_p12) target bundleno = 1519 (0x5ef), region = 44 }
  0x47   : > { %s3846_s14 = sand.u32 1, %s3680_s22   ;;  %p4948_p1 = scmp.ne.s32.totalorder %s4939_s27, 0 }
  0x48   : > { %s3084_s15 = sshll.u32 %s3846_s14, 5  ;;  %s247_s16 = scalar_lea.sflag [#allocation5], %s3846_s14 }
  0x49   : > { %s3852_s5 = scalar_lea.vmem [#allocation4], %s3084_s15 }
  0x4a   : > { %3663 = dma.done.wait (%p4948_p1), %s247_s16, 512  }
  0x4b   : > { %3665 = vsyncadd (%p4948_p1), %s247_s16, 4294966784  ;;  %p4949_p4 = scmp.eq.s32.totalorder %s3760_s25, 0 }
  0x4d   : > { %3667 = dma.done.wait (%p4949_p4), [#allocation8], 1024   ;;  %p4950_p6 = pmov %p4949_p4 }
  0x4e   : > { %v4887_v0 = vmov 0   ;;  %v3879_v3 = vld [vmem:[%s3852_s5 + $0x10] sm:$0xff]  ;;  %v3882_v4 = vld [vmem:[%s3852_s5] sm:$0xff]  ;;  %s3695_s27 = smov 111   ;;  %v3889_v5 = vld [vmem:[%s3852_s5 + $0x18] sm:$0xff]  ;;  %s3696_s29 = smov 113   ;;  %v294_v10 = vlaneseq }
  0x4f   : > { %3669 = vsyncadd (%p4950_p6), [#allocation8], 4294966272  ;;  %v3864_v1 = vcombine.high %v4887_v0, %v4887_v0  ;;  %v3868_v2 = vcombine.low %v4887_v0, %v4887_v0  ;;  %3550 = vset.pattern.permute.xlu0 %v4887_v0  ;;  %3551 = vset.pattern.permute.xlu1 %v4887_v0  ;;  %v3892_v6 = vld [vmem:[%s3852_s5 + $0x8] sm:$0xff]  ;;  %s3697_s12 = smov 112   ;;  %s3698_s10 = smov 127   ;;  %v3963_v7 = vld [vmem:[%s4877_s1] sm:$0xff] }
  0x50   : > { %743 = vrot.lane.b32.xlu1 %v3879_v3, %s3695_s27  ;;  %739 = vrot.lane.b32.xlu0 %v3882_v4, %s3695_s27  ;;  %s3699_s11 = smov 15   ;;  %s3700_s13 = smov 1   ;;  %v3110_v8 = vcombine.high %v3963_v7, %v3963_v7  ;;  %v839_v9 = vld [vmem:[%s4878_s2] sm:$0xff]  ;;  %v3970_v11 = vand.u32 127, %v294_v10  ;;  %v3973_v14 = vld [vmem:[#allocation7 + $0x30] ss:$0 sm:$0xff] }
  0x51   : > { %4951 = vst [vmem:[#allocation13_spill] sm:$0xff] %v3864_v1  ;;  %4952 = vst [vmem:[#allocation14_spill] sm:$0xff] %v3868_v2  ;;  %1172 = vmatprep.subr.bf16.mxu0 %v3864_v1  ;;  %1213 = vmatprep.subr.bf16.mxu1 %v3864_v1  ;;  %s3701_s20 = smov 17   ;;  %s3702_s30 = smov 16   ;;  %v3975_v15 = vld [vmem:[#allocation7 + $0x38] ss:$0 sm:$0xff] }
  0x52   : > { %1173 = vmatpush1.bf16.msra.mxu0 %v3868_v2  ;;  %1214 = vmatpush1.bf16.msra.mxu1 %v3868_v2  ;;  %vm747_vm0 = vcmp.lt.s32.totalorder %v3970_v11, 111  ;;  %4953 = vst [vmem:[#allocation15_spill] sm:$0xff] %v3973_v14  ;;  %4954 = vst [vmem:[#allocation16_spill] sm:$0xff] %v3975_v15  ;;  %v3977_v16 = vld [vmem:[#allocation7 + $0x20] ss:$0 sm:$0xff]  ;;  %v4005_v32 = vshrl.u32 %v294_v10, 7 }
  0x53   : > { %1174 = vmatprep.subr.bf16.mxu0 %v3864_v1  ;;  %1215 = vmatprep.subr.bf16.mxu1 %v3864_v1  ;;  %4955 = vst [vmem:[#allocation17_spill] sm:$0xff] %v3977_v16  ;;  %v3979_v17 = vld [vmem:[#allocation7 + $0x28] ss:$0 sm:$0xff]  ;;  %v4011_v39 = vld [vmem:[#allocation7 + $0x18] sm:$0xff]  ;;  %v4017_v43 = vld [vmem:[#allocation7 + $0x10] sm:$0xff]  ;;  %vm712_vm1 = vcmp.lt.s32.totalorder %v3970_v11, 112 }
  0x54   : > { %745 = vrot.lane.b32.xlu1 %v3889_v5, %s3695_s27  ;;  %741 = vrot.lane.b32.xlu0 %v3892_v6, %s3695_s27  ;;  %4956 = vst [vmem:[#allocation18_spill] sm:$0xff] %v3979_v17  ;;  %v4013_v40 = vld [vmem:[#allocation7 + $0x8] sm:$0xff]  ;;  %v392_v41 = vsub.s32 7, %v4005_v32  ;;  %v376_v42 = vsub.s32 6, %v4005_v32  ;;  %vm677_vm2 = vcmp.lt.s32.totalorder %v3970_v11, 113  ;;  %v4021_v44 = vld [vmem:[#allocation7] sm:$0xff] }
  0x55   : > { %1204 = vmatprep.mubr.bf16.mxu0 %v3110_v8  ;;  %1245 = vmatprep.mubr.bf16.mxu1 %v3110_v8  ;;  %v360_v8 = vsub.s32 5, %v4005_v32  ;;  %vm642_vm3 = vcmp.lt.s32.totalorder %v3970_v11, 127  ;;  %vm570_vm4 = vcmp.lt.s32.totalorder %v3970_v11, 15  ;;  %vm605_vm5 = vcmp.lt.s32.totalorder %v3970_v11, 1  ;;  %s282_s7 = scalar_lea.vmem [#allocation9], %s3084_s15  ;;  %p5028_p3 = scmp.ne.s32.totalorder %s4945_s18, 0 }
  0x56   : > { %1175 = vmatpush1.bf16.msra.mxu0 %v3868_v2  ;;  %1216 = vmatpush1.bf16.msra.mxu1 %v3868_v2  ;;  %v4024_v45 = vrot.slane %v4011_v39, %v376_v42  ;;  %v4027_v46 = vrot.slane %v4013_v40, %v376_v42  ;;  %v4032_v50 = vrot.slane %v4017_v43, %v376_v42  ;;  %vm500_vm6 = vcmp.lt.s32.totalorder %v3970_v11, 17  ;;  %s2996_s16 = sshll.u32 %s282_s7, 4  ;;  %s4835_s16 = int_to_ptr.vmem [resolvable:$true] %s2996_s16 }
  0x57   : > { %1176 = vmatprep.subr.bf16.mxu0 %v3864_v1  ;;  %1217 = vmatprep.subr.bf16.mxu1 %v3864_v1  ;;  %v4037_v52 = vrot.slane %v4021_v44, %v392_v41  ;;  %v4042_v54 = vrot.slane %v4011_v39, %v392_v41  ;;  %v4045_v55 = vrot.slane %v4013_v40, %v392_v41  ;;  %vm535_vm7 = vcmp.lt.s32.totalorder %v3970_v11, 16  ;;  %s3620_s15 = scalar_lea.vmem %s4835_s16, 512 }
  0x58   : > { %671 = vrot.lane.b32.xlu1 %v3892_v6, %s3696_s29  ;;  %669 = vrot.lane.b32.xlu0 %v3882_v4, %s3696_s29  ;;  %v4048_v56 = vrot.slane %v4017_v43, %v392_v41  ;;  %v4051_v57 = vrot.slane %v4021_v44, %v376_v42  ;;  %vm2887_vm8 = vcmask 261120   ;;  %p3621_p8 = scmp.ne.s32.totalorder %s4835_s16, %s3620_s15 }
  0x59   : > { %4957 = vst [vmem:[#allocation19_spill] sm:$0xff] %v4037_v52  ;;  %4958 = vst [vmem:[#allocation20_spill] sm:$0xff] %v4042_v54 }
  0x5a   : > { %1177 = vmatpush1.bf16.msra.mxu0 %v3868_v2  ;;  %1218 = vmatpush1.bf16.msra.mxu1 %v3868_v2  ;;  %4959 = vst [vmem:[#allocation21_spill] sm:$0xff] %v4045_v55  ;;  %4960 = vst [vmem:[#allocation22_spill] sm:$0xff] %v4048_v56  ;;  %p3622_p11 = pnand %p3621_p8, %p5028_p3 }
  0x5c   : > { %675 = vrot.lane.b32.xlu1 %v3889_v5, %s3696_s29  ;;  %673 = vrot.lane.b32.xlu0 %v3879_v3, %s3696_s29  ;;  %p3623_p7 = pneg %p3622_p11 }
  0x60   : > { %706 = vrot.lane.b32.xlu1 %v3892_v6, %s3697_s12  ;;  %704 = vrot.lane.b32.xlu0 %v3882_v4, %s3697_s12 }
  0x64   : > { %710 = vrot.lane.b32.xlu1 %v3889_v5, %s3697_s12  ;;  %708 = vrot.lane.b32.xlu0 %v3879_v3, %s3697_s12 }
  0x68   : > { %636 = vrot.lane.b32.xlu1 %v3892_v6, %s3698_s10  ;;  %634 = vrot.lane.b32.xlu0 %v3882_v4, %s3698_s10 }
  0x6c   : > { %640 = vrot.lane.b32.xlu1 %v3889_v5, %s3698_s10  ;;  %638 = vrot.lane.b32.xlu0 %v3879_v3, %s3698_s10 }
  0x70   : > { %564 = vrot.lane.b32.xlu1 %v3892_v6, %s3699_s11  ;;  %562 = vrot.lane.b32.xlu0 %v3882_v4, %s3699_s11 }
  0x74   : > { %568 = vrot.lane.b32.xlu1 %v3889_v5, %s3699_s11  ;;  %566 = vrot.lane.b32.xlu0 %v3879_v3, %s3699_s11 }
  0x78   : > { %599 = vrot.lane.b32.xlu1 %v3892_v6, %s3700_s13  ;;  %597 = vrot.lane.b32.xlu0 %v3882_v4, %s3700_s13 }
  0x7c   : > { %603 = vrot.lane.b32.xlu1 %v3889_v5, %s3700_s13  ;;  %601 = vrot.lane.b32.xlu0 %v3879_v3, %s3700_s13 }
  0x80   : > { %492 = vrot.lane.b32.xlu1 %v3892_v6, %s3701_s20  ;;  %490 = vrot.lane.b32.xlu0 %v3882_v4, %s3701_s20 }
  0x84   : > { %496 = vrot.lane.b32.xlu1 %v3889_v5, %s3701_s20  ;;  %494 = vrot.lane.b32.xlu0 %v3879_v3, %s3701_s20 }
  0x88   : > { %529 = vrot.lane.b32.xlu1 %v3892_v6, %s3702_s30  ;;  %527 = vrot.lane.b32.xlu0 %v3882_v4, %s3702_s30 }
  0x8c   : > { %533 = vrot.lane.b32.xlu1 %v3889_v5, %s3702_s30  ;;  %531 = vrot.lane.b32.xlu0 %v3879_v3, %s3702_s30 }
  0x90   : > { %842 = vperm.xlu0 %3550, %v839_v9  }
  0xc2   : > { %v744_v12 = vpop.permute.xlu1 %743  ;;  %v740_v13 = vpop.permute.xlu0 %739 }
  0xc6   : > { %v746_v18 = vpop.permute.xlu1 %745  ;;  %v742_v19 = vpop.permute.xlu0 %741 }
  0xc7   : > { %v748_v20 = vsel %vm747_vm0, %v744_v12, %v746_v18  ;;  %v751_v21 = vsel %vm747_vm0, %v746_v18, %v740_v13  ;;  %v749_v22 = vsel %vm747_vm0, %v742_v19, %v744_v12  ;;  %v750_v23 = vsel %vm747_vm0, %v740_v13, %v742_v19 }
  0xc8   : > { %v3990_v24 = vmul.f32 %v3973_v14, %v748_v20  ;;  %v3993_v25 = vmul.f32 %v3975_v15, %v751_v21  ;;  %v3996_v26 = vmul.f32 %v3977_v16, %v750_v23  ;;  %v3999_v27 = vmul.f32 %v3979_v17, %v749_v22 }
  0xca   : > { %v3382_v28 = vpack.c.bf16 %v3993_v25, %v3990_v24  ;;  %v3381_v29 = vpack.c.bf16 %v3999_v27, %v3996_v26  ;;  %v672_v30 = vpop.permute.xlu1 %671  ;;  %v670_v31 = vpop.permute.xlu0 %669 }
  0xcb   : > { %v680_v59 = vsel %vm677_vm2, %v670_v31, %v672_v30 }
  0xcc   : > { %v3128_v33 = vcombine.high %v3381_v29, %v4887_v0  ;;  %v3130_v34 = vcombine.high %v3382_v28, %v4887_v0  ;;  %v3127_v35 = vcombine.low %v3381_v29, %v4887_v0  ;;  %v3129_v36 = vcombine.low %v3382_v28, %v4887_v0 }
  0xcd   : > { %v682_v22 = vmul.f32 %v680_v59, %v4051_v57 }
  0xce   : > { %v676_v37 = vpop.permute.xlu1 %675  ;;  %v674_v38 = vpop.permute.xlu0 %673  ;;  %1178 = vmatprep.subr.bf16.mxu0 %v3128_v33  ;;  %1219 = vmatprep.subr.bf16.mxu1 %v3130_v34  ;;  %v4080_v33 = vrot.slane %v4021_v44, %v360_v8 }
  0xcf   : > { %1179 = vmatpush1.bf16.msra.mxu0 %v3127_v35  ;;  %1220 = vmatpush1.bf16.msra.mxu1 %v3129_v36  ;;  %v681_v49 = vsel %vm677_vm2, %v676_v37, %v670_v31  ;;  %v679_v51 = vsel %vm677_vm2, %v672_v30, %v674_v38  ;;  %v678_v58 = vsel %vm677_vm2, %v674_v38, %v676_v37 }
  0xd0   : > { %v685_v60 = vmul.f32 %v681_v49, %v4024_v45  ;;  %v683_v61 = vmul.f32 %v679_v51, %v4027_v46  ;;  %v684_v18 = vmul.f32 %v678_v58, %v4032_v50  ;;  %v4085_v35 = vrot.slane %v4011_v39, %v360_v8 }
  0xd1   : > { %v4092_v37 = vrot.slane %v4013_v40, %v360_v8  ;;  %v4095_v38 = vrot.slane %v4017_v43, %v360_v8 }
  0xd2   : > { %v707_v47 = vpop.permute.xlu1 %706  ;;  %v705_v48 = vpop.permute.xlu0 %704  ;;  %4961 = vst [vmem:[#allocation23_spill] sm:$0xff] %v4085_v35 }
  0xd3   : > { %v715_v53 = vsel %vm712_vm1, %v705_v48, %v707_v47  ;;  %4962 = vst [vmem:[#allocation24_spill] sm:$0xff] %v4095_v38 }
  0xd4   : > { %v717_v9 = vmul.f32 %v715_v53, %v4037_v52 }
  0xd6   : > { %v711_v62 = vpop.permute.xlu1 %710  ;;  %v709_v63 = vpop.permute.xlu0 %708  ;;  %v4082_v34 = vpack.c.bf16 %v717_v9, %v682_v22 }
  0xd7   : > { %v716_v10 = vsel %vm712_vm1, %v711_v62, %v705_v48  ;;  %v713_v12 = vsel %vm712_vm1, %v709_v63, %v711_v62  ;;  %v714_v13 = vsel %vm712_vm1, %v707_v47, %v709_v63 }
  0xd8   : > { %v720_v19 = vmul.f32 %v716_v10, %v4042_v54  ;;  %v718_v20 = vmul.f32 %v714_v13, %v4045_v55  ;;  %v719_v21 = vmul.f32 %v713_v12, %v4048_v56  ;;  %v328_v10 = vsub.s32 2, %v4005_v32 }
  0xd9   : > { %v344_v12 = vsub.s32 3, %v4005_v32 }
  0xda   : > { %v637_v23 = vpop.permute.xlu1 %636  ;;  %v635_v28 = vpop.permute.xlu0 %634  ;;  %v4073_v29 = vpack.c.bf16 %v718_v20, %v683_v61  ;;  %v4075_v30 = vpack.c.bf16 %v720_v19, %v685_v60  ;;  %v4077_v31 = vpack.c.bf16 %v719_v21, %v684_v18  ;;  %v4138_v18 = vrot.slane %v4021_v44, %v328_v10 }
  0xdb   : > { %v645_v36 = vsel %vm642_vm3, %v635_v28, %v637_v23  ;;  %v4141_v19 = vrot.slane %v4017_v43, %v328_v10  ;;  %v4144_v20 = vrot.slane %v4011_v39, %v328_v10 }
  0xdc   : > { %1180 = vmatprep.subr.bf16.mxu0 %v4073_v29  ;;  %1221 = vmatprep.subr.bf16.mxu1 %v4075_v30  ;;  %v647_v47 = vmul.f32 %v645_v36, %v4080_v33  ;;  %4965 = vst [vmem:[#allocation27_spill] sm:$0xff] %v4138_v18  ;;  %v4151_v36 = vrot.slane %v4021_v44, %v344_v12 }
  0xdd   : > { %1181 = vmatpush1.bf16.msra.mxu0 %v4082_v34  ;;  %1222 = vmatpush1.bf16.msra.mxu1 %v4077_v31  ;;  %4966 = vst [vmem:[#allocation28_spill] sm:$0xff] %v4141_v19  ;;  %4967 = vst [vmem:[#allocation29_spill] sm:$0xff] %v4144_v20 }
  0xde   : > { %v641_v41 = vpop.permute.xlu1 %640  ;;  %v639_v42 = vpop.permute.xlu0 %638  ;;  %v4119_v9 = vpack.c.bf16 %v647_v47, %v3882_v4  ;;  %v4133_v4 = vrot.slane %v4013_v40, %v344_v12  ;;  %4968 = vst [vmem:[#allocation30_spill] sm:$0xff] %v4151_v36 }
  0xdf   : > { %v646_v48 = vsel %vm642_vm3, %v641_v41, %v635_v28  ;;  %v643_v49 = vsel %vm642_vm3, %v639_v42, %v641_v41  ;;  %v644_v51 = vsel %vm642_vm3, %v637_v23, %v639_v42  ;;  %v4154_v41 = vrot.slane %v4017_v43, %v344_v12 }
  0xe0   : > { %v650_v53 = vmul.f32 %v646_v48, %v4085_v35  ;;  %v648_v58 = vmul.f32 %v644_v51, %v4092_v37  ;;  %v649_v59 = vmul.f32 %v643_v49, %v4095_v38  ;;  %4964 = vst [vmem:[#allocation26_spill] sm:$0xff] %v4133_v4  ;;  %v4161_v49 = vrot.slane %v4011_v39, %v344_v12 }
  0xe1   : > { %4969 = vst [vmem:[#allocation31_spill] sm:$0xff] %v4154_v41 }
  0xe2   : > { %v565_v60 = vpop.permute.xlu1 %564  ;;  %v563_v61 = vpop.permute.xlu0 %562  ;;  %v4110_v62 = vpack.c.bf16 %v648_v58, %v3892_v6  ;;  %v4113_v63 = vpack.c.bf16 %v650_v53, %v3889_v5  ;;  %v4116_v8 = vpack.c.bf16 %v649_v59, %v3879_v3  ;;  %v4129_v6 = vrot.slane %v4013_v40, %v328_v10  ;;  %4970 = vst [vmem:[#allocation32_spill] sm:$0xff] %v4161_v49 }
  0xe3   : > { %v573_v13 = vsel %vm570_vm4, %v563_v61, %v565_v60 }
  0xe4   : > { %1182 = vmatprep.subr.bf16.mxu0 %v4110_v62  ;;  %1223 = vmatprep.subr.bf16.mxu1 %v4113_v63  ;;  %4963 = vst [vmem:[#allocation25_spill] sm:$0xff] %v4129_v6  ;;  %v576_v42 = vmul.f32 %v573_v13, %v4129_v6 }
  0xe5   : > { %1183 = vmatpush1.bf16.msra.mxu0 %v4119_v9  ;;  %1224 = vmatpush1.bf16.msra.mxu1 %v4116_v8 }
  0xe6   : > { %v569_v5 = vpop.permute.xlu1 %568  ;;  %v567_v3 = vpop.permute.xlu0 %566 }
  0xe7   : > { %v574_v23 = vsel %vm570_vm4, %v569_v5, %v563_v61  ;;  %v572_v47 = vsel %vm570_vm4, %v565_v60, %v567_v3  ;;  %v571_v51 = vsel %vm570_vm4, %v567_v3, %v569_v5 }
  0xe8   : > { %v575_v53 = vmul.f32 %v574_v23, %v4138_v18  ;;  %v577_v10 = vmul.f32 %v572_v47, %v4141_v19 }
  0xea   : > { %v600_v21 = vpop.permute.xlu1 %599  ;;  %v598_v22 = vpop.permute.xlu0 %597 }
  0xeb   : > { %v608_v28 = vsel %vm605_vm5, %v598_v22, %v600_v21 }
  0xec   : > { %v611_v48 = vmul.f32 %v608_v28, %v4133_v4  ;;  %v578_v28 = vmul.f32 %v571_v51, %v4144_v20  ;;  %v312_v51 = vsub.s32 1, %v4005_v32 }
  0xee   : > { %v604_v58 = vpop.permute.xlu1 %603  ;;  %v602_v59 = vpop.permute.xlu0 %601  ;;  %v4166_v61 = vpack.c.bf16 %v611_v48, %v576_v42  ;;  %v4215_v0 = vrot.slane %v4021_v44, %v312_v51  ;;  %v4218_v56 = vrot.slane %v4017_v43, %v312_v51  ;;  %v4225_v16 = vrot.slane %v4011_v39, %v312_v51 }
  0xef   : > { %v609_v13 = vsel %vm605_vm5, %v604_v58, %v598_v22  ;;  %v606_v60 = vsel %vm605_vm5, %v602_v59, %v604_v58  ;;  %v607_v12 = vsel %vm605_vm5, %v600_v21, %v602_v59  ;;  %v296_v21 = vsub.s32 0, %v4005_v32 }
  0xf0   : > { %v610_v5 = vmul.f32 %v609_v13, %v4151_v36  ;;  %v612_v3 = vmul.f32 %v607_v12, %v4154_v41  ;;  %v613_v23 = vmul.f32 %v606_v60, %v4161_v49  ;;  %1184 = vmatprep.subr.bf16.mxu0 %v4166_v61  ;;  %4977 = vst [vmem:[#allocation39_spill] sm:$0xff] %v4215_v0  ;;  %4978 = vst [vmem:[#allocation40_spill] sm:$0xff] %v4218_v56 }
  0xf1   : > { %v4202_v12 = vrot.slane %v4021_v44, %v296_v21  ;;  %v4205_v32 = vrot.slane %v4017_v43, %v296_v21  ;;  %4979 = vst [vmem:[#allocation41_spill] sm:$0xff] %v4225_v16 }
  0xf2   : > { %v493_v42 = vpop.permute.xlu1 %492  ;;  %v491_v47 = vpop.permute.xlu0 %490  ;;  %v4180_v48 = vpack.c.bf16 %v610_v5, %v575_v53  ;;  %v4182_v22 = vpack.c.bf16 %v613_v23, %v578_v28  ;;  %v4184_v58 = vpack.c.bf16 %v612_v3, %v577_v10  ;;  %v4193_v53 = vrot.slane %v4013_v40, %v296_v21 }
  0xf3   : > { %v4197_v10 = vrot.slane %v4013_v40, %v312_v51  ;;  %v503_v60 = vsel %vm500_vm6, %v491_v47, %v493_v42  ;;  %4974 = vst [vmem:[#allocation36_spill] sm:$0xff] %v4202_v12  ;;  %4975 = vst [vmem:[#allocation37_spill] sm:$0xff] %v4205_v32  ;;  %v4208_v28 = vrot.slane %v4011_v39, %v296_v21 }
  0xf4   : > { %4971 = vst [vmem:[#allocation33_spill] sm:$0xff] %v4184_v58  ;;  %1185 = vmatpush1.bf16.msra.mxu0 %v4180_v48  ;;  %1225 = vmatprep.subr.bf16.mxu1 %v4182_v22  ;;  %4972 = vst [vmem:[#allocation34_spill] sm:$0xff] %v4193_v53  ;;  %v506_v52 = vmul.f32 %v503_v60, %v4193_v53 }
  0xf5   : > { %1226 = vmatpush1.bf16.msra.mxu1 %v4184_v58  ;;  %4973 = vst [vmem:[#allocation35_spill] sm:$0xff] %v4197_v10  ;;  %4976 = vst [vmem:[#allocation38_spill] sm:$0xff] %v4208_v28 }
  0xf6   : > { %v497_v59 = vpop.permute.xlu1 %496  ;;  %v495_v13 = vpop.permute.xlu0 %494 }
  0xf7   : > { %v504_v23 = vsel %vm500_vm6, %v497_v59, %v491_v47  ;;  %v502_v21 = vsel %vm500_vm6, %v493_v42, %v495_v13  ;;  %v501_v47 = vsel %vm500_vm6, %v495_v13, %v497_v59 }
  0xf8   : > { %v505_v54 = vmul.f32 %v504_v23, %v4202_v12  ;;  %v507_v43 = vmul.f32 %v502_v21, %v4205_v32  ;;  %v508_v51 = vmul.f32 %v501_v47, %v4208_v28 }
  0xfa   : > { %v530_v5 = vpop.permute.xlu1 %529  ;;  %v528_v3 = vpop.permute.xlu0 %527 }
  0xfb   : > { %v538_v40 = vsel %vm535_vm7, %v528_v3, %v530_v5 }
  0xfc   : > { %v541_v14 = vmul.f32 %v538_v40, %v4197_v10 }
  0xfe   : > { %v534_v44 = vpop.permute.xlu1 %533  ;;  %v532_v55 = vpop.permute.xlu0 %531  ;;  %v4230_v15 = vpack.c.bf16 %v541_v14, %v506_v52 }
  0xff   : > { %v539_v60 = vsel %vm535_vm7, %v534_v44, %v528_v3  ;;  %v536_v42 = vsel %vm535_vm7, %v532_v55, %v534_v44  ;;  %v537_v39 = vsel %vm535_vm7, %v530_v5, %v532_v55 }
 0x100   : > { %4980 = vst [vmem:[#allocation42_spill] sm:$0xff] %v4230_v15  ;;  %v540_v59 = vmul.f32 %v539_v60, %v4215_v0  ;;  %v542_v13 = vmul.f32 %v537_v39, %v4218_v56  ;;  %v543_v14 = vmul.f32 %v536_v42, %v4225_v16  ;;  %1186 = vmatprep.subr.bf16.mxu0 %v4230_v15 }
 0x102   : > { %v4244_v52 = vpack.c.bf16 %v540_v59, %v505_v54  ;;  %v4246_v23 = vpack.c.bf16 %v543_v14, %v508_v51  ;;  %v4248_v3 = vpack.c.bf16 %v542_v13, %v507_v43  ;;  %v3109_v54 = vcombine.low %v3963_v7, %v3963_v7 }
 0x104   : > { %4981 = vst [vmem:[#allocation43_spill] sm:$0xff] %v4244_v52  ;;  %4982 = vst [vmem:[#allocation44_spill] sm:$0xff] %v4246_v23  ;;  %1187 = vmatpush1.bf16.msra.mxu0 %v4244_v52  ;;  %1227 = vmatprep.subr.bf16.mxu1 %v4246_v23 }
 0x105   : > { %4983 = vst [vmem:[#allocation45_spill] sm:$0xff] %v4248_v3  ;;  %1228 = vmatpush1.bf16.msra.mxu1 %v4248_v3  ;;  %1188 = vmatprep.subr.bf16.mxu0 %v3864_v1 }
 0x106   : > { %1229 = vmatprep.subr.bf16.mxu1 %v3864_v1 }
 0x108   : > { %1189 = vmatpush2.bf16.msra.mxu0 %v3868_v2 }
 0x109   : > { %1230 = vmatpush2.bf16.msra.mxu1 %v3868_v2  ;;  %1190 = vmatprep.subr.bf16.mxu0 %v3864_v1 }
 0x10a   : > { %1231 = vmatprep.subr.bf16.mxu1 %v3864_v1 }
 0x10b   : > { %v843_v55 = vpop.permute.xlu0 %842 }
 0x10c   : > { %1191 = vmatpush2.bf16.msra.mxu0 %v3868_v2 }
 0x10d   : > { %1232 = vmatpush2.bf16.msra.mxu1 %v3868_v2  ;;  %1192 = vmatprep.subr.bf16.mxu0 %v3864_v1 }
 0x10e   : > { %1233 = vmatprep.subr.bf16.mxu1 %v3864_v1 }
 0x110   : > { %1193 = vmatpush2.bf16.msra.mxu0 %v3868_v2 }
 0x111   : > { %1234 = vmatpush2.bf16.msra.mxu1 %v3868_v2  ;;  %1194 = vmatprep.subr.bf16.mxu0 %v3864_v1 }
 0x112   : > { %1235 = vmatprep.subr.bf16.mxu1 %v3864_v1 }
 0x114   : > { %1195 = vmatpush2.bf16.msra.mxu0 %v3868_v2 }
 0x115   : > { %1236 = vmatpush2.bf16.msra.mxu1 %v3868_v2  ;;  %1196 = vmatprep.subr.bf16.mxu0 %v3864_v1 }
 0x116   : > { %1237 = vmatprep.subr.bf16.mxu1 %v3864_v1 }
 0x118   : > { %1197 = vmatpush2.bf16.msra.mxu0 %v3868_v2 }
 0x119   : > { %1238 = vmatpush2.bf16.msra.mxu1 %v3868_v2  ;;  %1198 = vmatprep.subr.bf16.mxu0 %v3864_v1 }
 0x11a   : > { %1239 = vmatprep.subr.bf16.mxu1 %v3864_v1 }
 0x11c   : > { %1199 = vmatpush2.bf16.msra.mxu0 %v3868_v2 }
 0x11d   : > { %1240 = vmatpush2.bf16.msra.mxu1 %v3868_v2  ;;  %1200 = vmatprep.subr.bf16.mxu0 %v3864_v1 }
 0x11e   : > { %1241 = vmatprep.subr.bf16.mxu1 %v3864_v1 }
 0x120   : > { %1201 = vmatpush2.bf16.msra.mxu0 %v3868_v2 }
 0x121   : > { %1242 = vmatpush2.bf16.msra.mxu1 %v3868_v2  ;;  %1202 = vmatprep.subr.bf16.mxu0 %v3864_v1 }
 0x122   : > { %1243 = vmatprep.subr.bf16.mxu1 %v3864_v1 }
 0x124   : > { %1203 = vmatpush2.bf16.msra.mxu0 %v3868_v2 }
 0x125   : > { %1244 = vmatpush2.bf16.msra.mxu1 %v3868_v2 }
 0x127   : > { %1205 = vmatmul.mubr.bf16.vlgmr.msra.gmra.mxu0 %v3109_v54 }
 0x128   : > { %1246 = vmatmul.mubr.bf16.vlgmr.msra.gmra.mxu1 %v3109_v54 }
 0x1e7   : > { %v1206_v5 = vpop.f32.mrf.mxu0 }
 0x1e8   : > { %v1207_v40 = vadd.f32 %v1206_v5, %v843_v55  ;;  %v1247_v21 = vpop.f32.mrf.mxu1 }
 0x1e9   : > { %v1248_v47 = vadd.f32 %v1247_v21, %v843_v55  ;;  %v1208_v44 = vpop.f32.mrf.mxu0 }
 0x1ea   : > { %v4287_v43 = vmax.f32 %v1207_v40, 0.0  ;;  %v1209_v60 = vadd.f32 %v1208_v44, %v843_v55  ;;  %v1249_v42 = vpop.f32.mrf.mxu1  ;;  %v4365_v40 = vld [vmem:[%s4877_s1 + $0x8] sm:$0xff] }
 0x1eb   : > { %v4289_v39 = vmax.f32 %v1248_v47, 0.0  ;;  %v1210_v51 = vpop.f32.mrf.mxu0  ;;  %v1250_v14 = vadd.f32 %v1249_v42, %v843_v55  ;;  %v3194_v55 = vld [vmem:[%s4878_s2 + $0x8] sm:$0xff]  ;;  %4988 = vst [vmem:[#allocation50_spill] sm:$0xff] %v4365_v40  ;;  %v3196_v21 = vcombine.high %v4365_v40, %v4365_v40 }
 0x1ec   : > { %4984 = vst [vmem:[#allocation46_spill] sm:$0xff] %v4287_v43  ;;  %v1251_v7 = vpop.f32.mrf.mxu1  ;;  %1414 = vrot.lane.b32.xlu1 %v4287_v43, %s3698_s10  ;;  %v4295_v13 = vmax.f32 %v1209_v60, 0.0 }
 0x1ed   : > { %4985 = vst [vmem:[#allocation47_spill] sm:$0xff] %v4289_v39  ;;  %1418 = vrot.lane.b32.xlu0 %v4289_v39, %s3698_s10  ;;  %v1211_v59 = vpop.f32.mrf.mxu0  ;;  %v4301_v5 = vmax.f32 %v1250_v14, 0.0  ;;  %1982 = vmatprep.mubr.bf16.mxu0 %v3196_v21 }
 0x1ee   : > { %4986 = vst [vmem:[#allocation48_spill] sm:$0xff] %v4295_v13  ;;  %v1252_v54 = vpop.f32.mrf.mxu1  ;;  %2023 = vmatprep.mubr.bf16.mxu1 %v3196_v21 }
 0x1ef   : > { %4987 = vst [vmem:[#allocation49_spill] sm:$0xff] %v4301_v5 }
 0x1f0   : > { %1416 = vrot.lane.b32.xlu1 %v4295_v13, %s3698_s10 }
 0x1f1   : > { %1448 = vrot.lane.b32.xlu0 %v4287_v43, %s3696_s29 }
 0x1f4   : > { %1420 = vrot.lane.b32.xlu1 %v4301_v5, %s3698_s10 }
 0x1f5   : > { %1452 = vrot.lane.b32.xlu0 %v4289_v39, %s3696_s29 }
 0x1f8   : > { %1450 = vrot.lane.b32.xlu1 %v4295_v13, %s3696_s29 }
 0x1f9   : > { %1378 = vrot.lane.b32.xlu0 %v4287_v43, %s3700_s13 }
 0x1fc   : > { %1454 = vrot.lane.b32.xlu1 %v4301_v5, %s3696_s29 }
 0x1fd   : > { %1382 = vrot.lane.b32.xlu0 %v4289_v39, %s3700_s13 }
 0x200   : > { %1380 = vrot.lane.b32.xlu1 %v4295_v13, %s3700_s13 }
 0x201   : > { %1310 = vrot.lane.b32.xlu0 %v4287_v43, %s3702_s30 }
 0x204   : > { %1384 = vrot.lane.b32.xlu1 %v4301_v5, %s3700_s13 }
 0x205   : > { %1314 = vrot.lane.b32.xlu0 %v4289_v39, %s3702_s30 }
 0x208   : > { %1312 = vrot.lane.b32.xlu1 %v4295_v13, %s3702_s30 }
 0x209   : > { %1344 = vrot.lane.b32.xlu0 %v4287_v43, %s3699_s11 }
 0x20c   : > { %1316 = vrot.lane.b32.xlu1 %v4301_v5, %s3702_s30 }
 0x20d   : > { %1348 = vrot.lane.b32.xlu0 %v4289_v39, %s3699_s11 }
 0x210   : > { %1346 = vrot.lane.b32.xlu1 %v4295_v13, %s3699_s11 }
 0x211   : > { %1276 = vrot.lane.b32.xlu0 %v4287_v43, %s3701_s20 }
 0x214   : > { %1350 = vrot.lane.b32.xlu1 %v4301_v5, %s3699_s11 }
 0x215   : > { %1280 = vrot.lane.b32.xlu0 %v4289_v39, %s3701_s20 }
 0x218   : > { %1278 = vrot.lane.b32.xlu1 %v4295_v13, %s3701_s20 }
 0x219   : > { %1482 = vrot.lane.b32.xlu0 %v4287_v43, %s3697_s12 }
 0x21c   : > { %1282 = vrot.lane.b32.xlu1 %v4301_v5, %s3701_s20 }
 0x21d   : > { %1486 = vrot.lane.b32.xlu0 %v4289_v39, %s3697_s12 }
 0x220   : > { %1484 = vrot.lane.b32.xlu1 %v4295_v13, %s3697_s12 }
 0x221   : > { %1516 = vrot.lane.b32.xlu0 %v4287_v43, %s3695_s27 }
 0x224   : > { %1488 = vrot.lane.b32.xlu1 %v4301_v5, %s3697_s12 }
 0x225   : > { %1520 = vrot.lane.b32.xlu0 %v4289_v39, %s3695_s27 }
 0x228   : > { %1518 = vrot.lane.b32.xlu1 %v4295_v13, %s3695_s27 }
 0x229   : > { %1620 = vperm.xlu0 %3550, %v3194_v55  }
 0x22c   : > { %1522 = vrot.lane.b32.xlu1 %v4301_v5, %s3695_s27 }
 0x25e   : > { %v1415_v47 = vpop.permute.xlu1 %1414 }
 0x25f   : > { %v1419_v44 = vpop.permute.xlu0 %1418 }
 0x262   : > { %v1417_v60 = vpop.permute.xlu1 %1416 }
 0x263   : > { %v1449_v42 = vpop.permute.xlu0 %1448  ;;  %v1423_v59 = vsel %vm642_vm3, %v1417_v60, %v1419_v44  ;;  %v1424_v14 = vsel %vm642_vm3, %v1415_v47, %v1417_v60 }
 0x264   : > { %v1426_v17 = vmul.f32 %v1424_v14, %v4080_v33  ;;  %v1427_v2 = vmul.f32 %v1423_v59, %v4092_v37 }
 0x266   : > { %v1421_v51 = vpop.permute.xlu1 %1420 }
 0x267   : > { %v1453_v7 = vpop.permute.xlu0 %1452  ;;  %v1422_v52 = vsel %vm642_vm3, %v1419_v44, %v1421_v51  ;;  %v1425_v60 = vsel %vm642_vm3, %v1421_v51, %v1415_v47 }
 0x26a   : > { %v1451_v54 = vpop.permute.xlu1 %1450 }
 0x26b   : > { %v1457_v55 = vsel %vm677_vm2, %v1451_v54, %v1453_v7  ;;  %v1458_v40 = vsel %vm677_vm2, %v1449_v42, %v1451_v54  ;;  %v1379_v21 = vpop.permute.xlu0 %1378  ;;  %v1428_v54 = vmul.f32 %v1422_v52, %v4095_v38 }
 0x26c   : > { %v1460_v1 = vmul.f32 %v1458_v40, %v4051_v57  ;;  %v1461_v3 = vmul.f32 %v1457_v55, %v4027_v46  ;;  %v1429_v55 = vmul.f32 %v1425_v60, %v4085_v35  ;;  %v5003_v35 = vld [vmem:[#allocation22_spill] sm:$0xff] }
 0x26e   : > { %v4385_v23 = vpack.c.bf16 %v1460_v1, %v1426_v17  ;;  %v1455_v58 = vpop.permute.xlu1 %1454  ;;  %v4387_v15 = vpack.c.bf16 %v1461_v3, %v1427_v2 }
 0x26f   : > { %v1456_v14 = vsel %vm677_vm2, %v1453_v7, %v1455_v58  ;;  %v1459_v59 = vsel %vm677_vm2, %v1455_v58, %v1449_v42  ;;  %v1383_v40 = vpop.permute.xlu0 %1382 }
 0x270   : > { %v1462_v44 = vmul.f32 %v1456_v14, %v4032_v50  ;;  %v1463_v47 = vmul.f32 %v1459_v59, %v4024_v45  ;;  %1950 = vmatprep.subr.bf16.mxu0 %v4387_v15 }
 0x271   : > { %1951 = vmatpush1.bf16.msra.mxu0 %v4385_v23 }
 0x272   : > { %v4399_v1 = vpack.c.bf16 %v1462_v44, %v1428_v54  ;;  %v1381_v2 = vpop.permute.xlu1 %1380  ;;  %v4401_v17 = vpack.c.bf16 %v1463_v47, %v1429_v55 }
 0x273   : > { %v1388_v58 = vsel %vm605_vm5, %v1379_v21, %v1381_v2  ;;  %v1311_v3 = vpop.permute.xlu0 %1310  ;;  %v1387_v52 = vsel %vm605_vm5, %v1381_v2, %v1383_v40 }
 0x274   : > { %v1391_v42 = vmul.f32 %v1388_v58, %v4133_v4  ;;  %1991 = vmatprep.subr.bf16.mxu1 %v4401_v17  ;;  %v1392_v60 = vmul.f32 %v1387_v52, %v4154_v41  ;;  %v4998_v4 = vld [vmem:[#allocation21_spill] sm:$0xff] }
 0x275   : > { %1992 = vmatpush1.bf16.msra.mxu1 %v4399_v1 }
 0x276   : > { %v1385_v51 = vpop.permute.xlu1 %1384  ;;  %v4411_v7 = vpack.c.bf16 %v4295_v13, %v1391_v42  ;;  %v4428_v52 = vpack.c.bf16 %v4289_v39, %v1392_v60 }
 0x277   : > { %v1386_v14 = vsel %vm605_vm5, %v1383_v40, %v1385_v51  ;;  %v1389_v59 = vsel %vm605_vm5, %v1385_v51, %v1379_v21  ;;  %v1315_v54 = vpop.permute.xlu0 %1314 }
 0x278   : > { %v1390_v55 = vmul.f32 %v1389_v59, %v4151_v36  ;;  %v1393_v44 = vmul.f32 %v1386_v14, %v4161_v49  ;;  %1952 = vmatprep.subr.bf16.mxu0 %v4411_v7 }
 0x27a   : > { %v4422_v47 = vpack.c.bf16 %v4287_v43, %v1390_v55  ;;  %v1313_v2 = vpop.permute.xlu1 %1312  ;;  %v4425_v58 = vpack.c.bf16 %v4301_v5, %v1393_v44 }
 0x27b   : > { %v1345_v40 = vpop.permute.xlu0 %1344  ;;  %v1320_v51 = vsel %vm535_vm7, %v1311_v3, %v1313_v2  ;;  %v1319_v13 = vsel %vm535_vm7, %v1313_v2, %v1315_v54 }
 0x27c   : > { %1953 = vmatpush1.bf16.msra.mxu0 %v4422_v47  ;;  %1993 = vmatprep.subr.bf16.mxu1 %v4425_v58  ;;  %v1323_v55 = vmul.f32 %v1320_v51, %v4197_v10 }
 0x27d   : > { %1994 = vmatpush1.bf16.msra.mxu1 %v4428_v52 }
 0x27e   : > { %v1317_v21 = vpop.permute.xlu1 %1316 }
 0x27f   : > { %v1349_v42 = vpop.permute.xlu0 %1348  ;;  %v1318_v39 = vsel %vm535_vm7, %v1315_v54, %v1317_v21  ;;  %v1321_v43 = vsel %vm535_vm7, %v1317_v21, %v1311_v3  ;;  %v1324_v54 = vmul.f32 %v1319_v13, %v4218_v56 }
 0x280   : > { %v1322_v10 = vmul.f32 %v1321_v43, %v4215_v0  ;;  %v1325_v41 = vmul.f32 %v1318_v39, %v4225_v16 }
 0x282   : > { %v1347_v14 = vpop.permute.xlu1 %1346 }
 0x283   : > { %v1354_v59 = vsel %vm570_vm4, %v1345_v40, %v1347_v14  ;;  %v1353_v60 = vsel %vm570_vm4, %v1347_v14, %v1349_v42  ;;  %v1277_v5 = vpop.permute.xlu0 %1276 }
 0x284   : > { %v1357_v44 = vmul.f32 %v1354_v59, %v4129_v6  ;;  %v1358_v51 = vmul.f32 %v1353_v60, %v4141_v19  ;;  %v4997_v19 = vld [vmem:[#allocation16_spill] sm:$0xff] }
 0x286   : > { %v1351_v49 = vpop.permute.xlu1 %1350  ;;  %v4447_v36 = vpack.c.bf16 %v1357_v44, %v1323_v55 }
 0x287   : > { %v1352_v14 = vsel %vm570_vm4, %v1349_v42, %v1351_v49  ;;  %v1355_v59 = vsel %vm570_vm4, %v1351_v49, %v1345_v40  ;;  %v4464_v42 = vpack.c.bf16 %v1358_v51, %v1324_v54  ;;  %v1281_v49 = vpop.permute.xlu0 %1280  ;;  %v4992_v54 = vld [vmem:[#allocation43_spill] sm:$0xff] }
 0x288   : > { %v1356_v3 = vmul.f32 %v1355_v59, %v4138_v18  ;;  %v1359_v21 = vmul.f32 %v1352_v14, %v4144_v20  ;;  %1954 = vmatprep.subr.bf16.mxu0 %v4447_v36 }
 0x28a   : > { %v4460_v2 = vpack.c.bf16 %v1356_v3, %v1322_v10  ;;  %v1279_v55 = vpop.permute.xlu1 %1278  ;;  %v4462_v60 = vpack.c.bf16 %v1359_v21, %v1325_v41 }
 0x28b   : > { %v1286_v43 = vsel %vm500_vm6, %v1277_v5, %v1279_v55  ;;  %v1285_v39 = vsel %vm500_vm6, %v1279_v55, %v1281_v49  ;;  %v1483_v55 = vpop.permute.xlu0 %1482 }
 0x28c   : > { %v1289_v40 = vmul.f32 %v1286_v43, %v4193_v53  ;;  %1955 = vmatpush1.bf16.msra.mxu0 %v4460_v2  ;;  %1995 = vmatprep.subr.bf16.mxu1 %v4462_v60  ;;  %v1290_v13 = vmul.f32 %v1285_v39, %v4205_v32  ;;  %v4994_v43 = vld [vmem:[#allocation13_spill] sm:$0xff]  ;;  %v4995_v39 = vld [vmem:[#allocation14_spill] sm:$0xff] }
 0x28d   : > { %1996 = vmatpush1.bf16.msra.mxu1 %v4464_v42 }
 0x28e   : > { %v1283_v10 = vpop.permute.xlu1 %1282  ;;  %v4475_v41 = vpack.c.bf16 %v1289_v40, %v3999_v27  ;;  %v4492_v21 = vpack.c.bf16 %v1290_v13, %v3990_v24  ;;  %v4989_v24 = vld [vmem:[#allocation42_spill] sm:$0xff] }
 0x28f   : > { %v1284_v44 = vsel %vm500_vm6, %v1281_v49, %v1283_v10  ;;  %v1287_v51 = vsel %vm500_vm6, %v1283_v10, %v1277_v5  ;;  %v4993_v49 = vld [vmem:[#allocation45_spill] sm:$0xff]  ;;  %v1487_v10 = vpop.permute.xlu0 %1486 }
 0x290   : > { %v1288_v14 = vmul.f32 %v1287_v51, %v4202_v12  ;;  %v1291_v59 = vmul.f32 %v1284_v44, %v4208_v28  ;;  %1956 = vmatprep.subr.bf16.mxu0 %v4475_v41  ;;  %v4996_v12 = vld [vmem:[#allocation18_spill] sm:$0xff] }
 0x292   : > { %v4486_v3 = vpack.c.bf16 %v1288_v14, %v3996_v26  ;;  %v4489_v27 = vpack.c.bf16 %v1291_v59, %v3993_v25  ;;  %v4990_v25 = vld [vmem:[#allocation33_spill] sm:$0xff]  ;;  %v4991_v26 = vld [vmem:[#allocation44_spill] sm:$0xff]  ;;  %v1485_v5 = vpop.permute.xlu1 %1484 }
 0x293   : > { %v1517_v44 = vpop.permute.xlu0 %1516  ;;  %v1491_v16 = vsel %vm712_vm1, %v1485_v5, %v1487_v10  ;;  %v1492_v18 = vsel %vm712_vm1, %v1483_v55, %v1485_v5  ;;  %v5002_v5 = vld [vmem:[#allocation19_spill] sm:$0xff] }
 0x294   : > { %1957 = vmatpush1.bf16.msra.mxu0 %v4486_v3  ;;  %1997 = vmatprep.subr.bf16.mxu1 %v4489_v27  ;;  %v1495_v6 = vmul.f32 %v1491_v16, %v4998_v4 }
 0x295   : > { %1958 = vmatprep.subr.bf16.mxu0 %v4073_v29  ;;  %1998 = vmatpush1.bf16.msra.mxu1 %v4492_v21 }
 0x296   : > { %1999 = vmatprep.subr.bf16.mxu1 %v4075_v30  ;;  %v1489_v40 = vpop.permute.xlu1 %1488 }
 0x297   : > { %v1521_v14 = vpop.permute.xlu0 %1520  ;;  %v1493_v0 = vsel %vm712_vm1, %v1489_v40, %v1483_v55  ;;  %v1494_v55 = vmul.f32 %v1492_v18, %v5002_v5 }
 0x298   : > { %1959 = vmatpush1.bf16.msra.mxu0 %v4082_v34 }
 0x299   : > { %1960 = vmatprep.subr.bf16.mxu0 %v4110_v62  ;;  %2000 = vmatpush1.bf16.msra.mxu1 %v4077_v31 }
 0x29a   : > { %2001 = vmatprep.subr.bf16.mxu1 %v4113_v63  ;;  %v1519_v13 = vpop.permute.xlu1 %1518 }
 0x29b   : > { %v1525_v59 = vsel %vm747_vm0, %v1519_v13, %v1521_v14  ;;  %v1526_v28 = vsel %vm747_vm0, %v1517_v44, %v1519_v13  ;;  %v1490_v13 = vsel %vm712_vm1, %v1487_v10, %v1489_v40  ;;  %v5005_v10 = vmov 0  }
 0x29c   : > { %1961 = vmatpush1.bf16.msra.mxu0 %v4119_v9  ;;  %v1529_v56 = vmul.f32 %v4996_v12, %v1525_v59  ;;  %v4999_v12 = vld [vmem:[#allocation20_spill] sm:$0xff]  ;;  %v5000_v59 = vld [vmem:[#allocation17_spill] sm:$0xff]  ;;  %v1496_v38 = vmul.f32 %v1490_v13, %v5003_v35 }
 0x29d   : > { %1962 = vmatprep.subr.bf16.mxu0 %v4166_v61  ;;  %2002 = vmatpush1.bf16.msra.mxu1 %v4116_v8 }
 0x29e   : > { %2003 = vmatprep.subr.bf16.mxu1 %v4182_v22  ;;  %v1523_v51 = vpop.permute.xlu1 %1522 }
 0x29f   : > { %v1527_v32 = vsel %vm747_vm0, %v1523_v51, %v1517_v44  ;;  %v1524_v53 = vsel %vm747_vm0, %v1521_v14, %v1523_v51  ;;  %v1497_v44 = vmul.f32 %v1493_v0, %v4999_v12  ;;  %v1528_v51 = vmul.f32 %v5000_v59, %v1526_v28 }
 0x2a0   : > { %1963 = vmatpush1.bf16.msra.mxu0 %v4180_v48  ;;  %v1531_v20 = vmul.f32 %v4997_v19, %v1527_v32  ;;  %v5001_v19 = vld [vmem:[#allocation15_spill] sm:$0xff]  ;;  %v4561_v14 = vpack.c.bf16 %v1529_v56, %v1495_v6  ;;  %v5004_v56 = vld [vmem:[#allocation50_spill] sm:$0xff] }
 0x2a1   : > { %1964 = vmatprep.subr.bf16.mxu0 %v4989_v24  ;;  %2004 = vmatpush1.bf16.msra.mxu1 %v4990_v25  ;;  %v1530_v32 = vmul.f32 %v5001_v19, %v1524_v53  ;;  %v4570_v0 = vpack.c.bf16 %v1528_v51, %v1494_v55  ;;  %v3195_v6 = vcombine.low %v5004_v56, %v5004_v56 }
 0x2a2   : > { %2005 = vmatprep.subr.bf16.mxu1 %v4991_v26  ;;  %v4565_v16 = vpack.c.bf16 %v1531_v20, %v1497_v44 }
 0x2a3   : > { %v4573_v28 = vpack.c.bf16 %v1530_v32, %v1496_v38 }
 0x2a4   : > { %1965 = vmatpush1.bf16.msra.mxu0 %v4992_v54 }
 0x2a5   : > { %2006 = vmatpush1.bf16.msra.mxu1 %v4993_v49  ;;  %1966 = vmatprep.subr.bf16.mxu0 %v4994_v43 }
 0x2a6   : > { %2007 = vmatprep.subr.bf16.mxu1 %v4994_v43 }
 0x2a8   : > { %1967 = vmatpush2.bf16.msra.mxu0 %v4995_v39 }
 0x2a9   : > { %2008 = vmatpush2.bf16.msra.mxu1 %v4995_v39  ;;  %1968 = vmatprep.subr.bf16.mxu0 %v4994_v43 }
 0x2aa   : > { %2009 = vmatprep.subr.bf16.mxu1 %v4994_v43 }
 0x2ac   : > { %1969 = vmatpush2.bf16.msra.mxu0 %v4995_v39 }
 0x2ad   : > { %2010 = vmatpush2.bf16.msra.mxu1 %v4995_v39  ;;  %1970 = vmatprep.subr.bf16.mxu0 %v4994_v43 }
 0x2ae   : > { %2011 = vmatprep.subr.bf16.mxu1 %v4994_v43 }
 0x2b0   : > { %1971 = vmatpush2.bf16.msra.mxu0 %v4995_v39 }
 0x2b1   : > { %2012 = vmatpush2.bf16.msra.mxu1 %v4995_v39  ;;  %1972 = vmatprep.subr.bf16.mxu0 %v4994_v43 }
 0x2b2   : > { %2013 = vmatprep.subr.bf16.mxu1 %v4994_v43 }
 0x2b4   : > { %1973 = vmatpush2.bf16.msra.mxu0 %v4995_v39 }
 0x2b5   : > { %2014 = vmatpush2.bf16.msra.mxu1 %v4995_v39  ;;  %1974 = vmatprep.subr.bf16.mxu0 %v4994_v43 }
 0x2b6   : > { %2015 = vmatprep.subr.bf16.mxu1 %v4994_v43 }
 0x2b8   : > { %1975 = vmatpush2.bf16.msra.mxu0 %v4995_v39 }
 0x2b9   : > { %2016 = vmatpush2.bf16.msra.mxu1 %v4995_v39  ;;  %1976 = vmatprep.subr.bf16.mxu0 %v4994_v43 }
 0x2ba   : > { %2017 = vmatprep.subr.bf16.mxu1 %v4994_v43 }
 0x2bc   : > { %1977 = vmatpush2.bf16.msra.mxu0 %v4995_v39 }
 0x2bd   : > { %2018 = vmatpush2.bf16.msra.mxu1 %v4995_v39  ;;  %1978 = vmatprep.subr.bf16.mxu0 %v4994_v43 }
 0x2be   : > { %2019 = vmatprep.subr.bf16.mxu1 %v4994_v43 }
 0x2c0   : > { %1979 = vmatpush2.bf16.msra.mxu0 %v4995_v39 }
 0x2c1   : > { %1980 = vmatprep.subr.bf16.mxu0 %v4561_v14  ;;  %2020 = vmatpush2.bf16.msra.mxu1 %v4995_v39 }
 0x2c2   : > { %2021 = vmatprep.subr.bf16.mxu1 %v4565_v16 }
 0x2c4   : > { %1981 = vmatpush2.bf16.msra.mxu0 %v4570_v0 }
 0x2c5   : > { %2022 = vmatpush2.bf16.msra.mxu1 %v4573_v28  ;;  %2728 = vmatprep.subr.bf16.mxu0 %v4387_v15  ;;  %v1621_v15 = vpop.permute.xlu0 %1620 }
 0x2c6   : > { %2769 = vmatprep.subr.bf16.mxu1 %v4401_v17  ;;  %v3280_v17 = vld [vmem:[%s4878_s2 + $0x10] sm:$0xff] }
 0x2c7   : > { %1983 = vmatmul.mubr.bf16.vlgmr.msra.gmra.mxu0 %v3195_v6 }
 0x2c8   : > { %2024 = vmatmul.mubr.bf16.vlgmr.msra.gmra.mxu1 %v3195_v6  ;;  %2729 = vmatpush1.bf16.msra.mxu0 %v4385_v23  ;;  %v4690_v23 = vld [vmem:[%s4877_s1 + $0x10] sm:$0xff] }
 0x2c9   : > { %2730 = vmatprep.subr.bf16.mxu0 %v4411_v7  ;;  %2770 = vmatpush1.bf16.msra.mxu1 %v4399_v1  ;;  %v3282_v1 = vcombine.high %v4690_v23, %v4690_v23  ;;  %v2841_v7 = vld [vmem:[%s4880_s4] sm:$0xff]  ;;  %v3281_v11 = vcombine.low %v4690_v23, %v4690_v23 }
 0x2ca   : > { %2771 = vmatprep.subr.bf16.mxu1 %v4425_v58 }
 0x2cb   : > { %2760 = vmatprep.mubr.bf16.mxu0 %v3282_v1  ;;  %2801 = vmatprep.mubr.bf16.mxu1 %v3282_v1 }
 0x2cc   : > { %2731 = vmatpush1.bf16.msra.mxu0 %v4422_v47 }
 0x2cd   : > { %2732 = vmatprep.subr.bf16.mxu0 %v4447_v36  ;;  %2772 = vmatpush1.bf16.msra.mxu1 %v4428_v52 }
 0x2ce   : > { %2773 = vmatprep.subr.bf16.mxu1 %v4462_v60 }
 0x2d0   : > { %2733 = vmatpush1.bf16.msra.mxu0 %v4460_v2 }
 0x2d1   : > { %2734 = vmatprep.subr.bf16.mxu0 %v4475_v41  ;;  %2774 = vmatpush1.bf16.msra.mxu1 %v4464_v42  ;;  %v3558_v42 = vld [vmem:[#allocation7 + $0x20] ss:$0 sm:$0xff] }
 0x2d2   : > { %2775 = vmatprep.subr.bf16.mxu1 %v4489_v27 }
 0x2d4   : > { %2735 = vmatpush1.bf16.msra.mxu0 %v4486_v3  ;;  %v3559_v3 = vld [vmem:[#allocation7 + $0x28] ss:$0 sm:$0xff] }
 0x2d5   : > { %2736 = vmatprep.subr.bf16.mxu0 %v4073_v29  ;;  %2776 = vmatpush1.bf16.msra.mxu1 %v4492_v21 }
 0x2d6   : > { %2777 = vmatprep.subr.bf16.mxu1 %v4075_v30 }
 0x2d8   : > { %2737 = vmatpush1.bf16.msra.mxu0 %v4082_v34 }
 0x2d9   : > { %2738 = vmatprep.subr.bf16.mxu0 %v4110_v62  ;;  %2778 = vmatpush1.bf16.msra.mxu1 %v4077_v31 }
 0x2da   : > { %2779 = vmatprep.subr.bf16.mxu1 %v4113_v63 }
 0x2dc   : > { %2739 = vmatpush1.bf16.msra.mxu0 %v4119_v9 }
 0x2dd   : > { %2740 = vmatprep.subr.bf16.mxu0 %v4166_v61  ;;  %2780 = vmatpush1.bf16.msra.mxu1 %v4116_v8 }
 0x2de   : > { %2781 = vmatprep.subr.bf16.mxu1 %v4182_v22 }
 0x2e0   : > { %2741 = vmatpush1.bf16.msra.mxu0 %v4180_v48 }
 0x2e1   : > { %2742 = vmatprep.subr.bf16.mxu0 %v4989_v24  ;;  %2782 = vmatpush1.bf16.msra.mxu1 %v4990_v25 }
 0x2e2   : > { %2783 = vmatprep.subr.bf16.mxu1 %v4991_v26 }
 0x2e4   : > { %2743 = vmatpush1.bf16.msra.mxu0 %v4992_v54  ;;  %v3560_v54 = vld [vmem:[#allocation7 + $0x30] ss:$0 sm:$0xff] }
 0x2e5   : > { %2784 = vmatpush1.bf16.msra.mxu1 %v4993_v49  ;;  %2744 = vmatprep.subr.bf16.mxu0 %v4994_v43 }
 0x2e6   : > { %2785 = vmatprep.subr.bf16.mxu1 %v4994_v43 }
 0x2e8   : > { %2745 = vmatpush2.bf16.msra.mxu0 %v4995_v39 }
 0x2e9   : > { %2786 = vmatpush2.bf16.msra.mxu1 %v4995_v39  ;;  %2746 = vmatprep.subr.bf16.mxu0 %v4994_v43 }
 0x2ea   : > { %2787 = vmatprep.subr.bf16.mxu1 %v4994_v43  ;;  %v3561_v43 = vld [vmem:[#allocation7 + $0x38] ss:$0 sm:$0xff] }
 0x2ec   : > { %2747 = vmatpush2.bf16.msra.mxu0 %v4995_v39 }
 0x2ed   : > { %2788 = vmatpush2.bf16.msra.mxu1 %v4995_v39 }
 0x387   : > { %v1984_v29 = vpop.f32.mrf.mxu0 }
 0x388   : > { %v1985_v30 = vadd.f32 %v1984_v29, %v1621_v15  ;;  %v2025_v31 = vpop.f32.mrf.mxu1 }
 0x389   : > { %v1986_v34 = vpop.f32.mrf.mxu0  ;;  %v2026_v62 = vadd.f32 %v2025_v31, %v1621_v15 }
 0x38a   : > { %v4619_v38 = vmax.f32 %v1985_v30, 0.0  ;;  %v1987_v63 = vadd.f32 %v1986_v34, %v1621_v15  ;;  %v2027_v8 = vpop.f32.mrf.mxu1 }
 0x38b   : > { %v1988_v9 = vpop.f32.mrf.mxu0  ;;  %v2028_v20 = vadd.f32 %v2027_v8, %v1621_v15  ;;  %v4625_v48 = vmax.f32 %v2026_v62, 0.0 }
 0x38c   : > { %v4621_v18 = vmax.f32 %v1987_v63, 0.0  ;;  %2294 = vrot.lane.b32.xlu1 %v4619_v38, %s3695_s27  ;;  %v2029_v36 = vpop.f32.mrf.mxu1 }
 0x38d   : > { %v1989_v61 = vpop.f32.mrf.mxu0  ;;  %v4629_v53 = vmax.f32 %v2028_v20, 0.0 }
 0x38e   : > { %2296 = vrot.lane.b32.xlu0 %v4621_v18, %s3695_s27  ;;  %v2030_v22 = vpop.f32.mrf.mxu1 }
 0x390   : > { %2298 = vrot.lane.b32.xlu1 %v4625_v48, %s3695_s27 }
 0x392   : > { %2300 = vrot.lane.b32.xlu0 %v4629_v53, %s3695_s27  ;;  %s3703_s27 = smov [#allocation9]  }
 0x394   : > { %2226 = vrot.lane.b32.xlu1 %v4619_v38, %s3696_s29 }
 0x396   : > { %2228 = vrot.lane.b32.xlu0 %v4621_v18, %s3696_s29 }
 0x398   : > { %2230 = vrot.lane.b32.xlu1 %v4625_v48, %s3696_s29 }
 0x39a   : > { %2232 = vrot.lane.b32.xlu0 %v4629_v53, %s3696_s29  ;;  %s3624_s29 = sshll.u32 %s3703_s27, 4  ;;  %s3625_s29 = int_to_ptr.vmem [resolvable:$false] %s3624_s29 }
 0x39b   : > { %p3627_p10 = scmp.lt.s32.totalorder %s4835_s16, %s3625_s29 }
 0x39c   : > { %2260 = vrot.lane.b32.xlu1 %v4619_v38, %s3697_s12 }
 0x39e   : > { %2262 = vrot.lane.b32.xlu0 %v4621_v18, %s3697_s12 }
 0x3a0   : > { %2264 = vrot.lane.b32.xlu1 %v4625_v48, %s3697_s12 }
 0x3a2   : > { %2266 = vrot.lane.b32.xlu0 %v4629_v53, %s3697_s12  ;;  %s3626_s12 = scalar_lea.vmem %s3625_s29, 1024 }
 0x3a3   : > { %p3628_p2 = scmp.lt.s32.totalorder %s3626_s12, %s3620_s15 }
 0x3a4   : > { %2192 = vrot.lane.b32.xlu1 %v4619_v38, %s3698_s10 }
 0x3a5   : > { %p3629_p13 = por %p3628_p2, %p3627_p10 }
 0x3a6   : > { %2194 = vrot.lane.b32.xlu0 %v4621_v18, %s3698_s10 }
 0x3a7   : > { %p3630_p0 = pnand %p3629_p13, %p3623_p7 }
 0x3a8   : > { %2196 = vrot.lane.b32.xlu1 %v4625_v48, %s3698_s10 }
 0x3aa   : > { %2198 = vrot.lane.b32.xlu0 %v4629_v53, %s3698_s10 }
 0x3ac   : > { %2122 = vrot.lane.b32.xlu1 %v4619_v38, %s3699_s11 }
 0x3ae   : > { %2124 = vrot.lane.b32.xlu0 %v4621_v18, %s3699_s11 }
 0x3b0   : > { %2126 = vrot.lane.b32.xlu1 %v4625_v48, %s3699_s11 }
 0x3b2   : > { %2128 = vrot.lane.b32.xlu0 %v4629_v53, %s3699_s11 }
 0x3b4   : > { %2156 = vrot.lane.b32.xlu1 %v4619_v38, %s3700_s13 }
 0x3b6   : > { %2158 = vrot.lane.b32.xlu0 %v4621_v18, %s3700_s13 }
 0x3b8   : > { %2160 = vrot.lane.b32.xlu1 %v4625_v48, %s3700_s13 }
 0x3ba   : > { %2162 = vrot.lane.b32.xlu0 %v4629_v53, %s3700_s13 }
 0x3bc   : > { %2054 = vrot.lane.b32.xlu1 %v4619_v38, %s3701_s20 }
 0x3be   : > { %2056 = vrot.lane.b32.xlu0 %v4621_v18, %s3701_s20 }
 0x3c0   : > { %2058 = vrot.lane.b32.xlu1 %v4625_v48, %s3701_s20 }
 0x3c2   : > { %2060 = vrot.lane.b32.xlu0 %v4629_v53, %s3701_s20 }
 0x3c4   : > { %2088 = vrot.lane.b32.xlu1 %v4619_v38, %s3702_s30 }
 0x3c6   : > { %2090 = vrot.lane.b32.xlu0 %v4621_v18, %s3702_s30 }
 0x3c8   : > { %2092 = vrot.lane.b32.xlu1 %v4625_v48, %s3702_s30 }
 0x3ca   : > { %2094 = vrot.lane.b32.xlu0 %v4629_v53, %s3702_s30 }
 0x3cc   : > { %2398 = vperm.xlu1 %3551, %v3280_v17  }
 0x3ce   : > { %2844 = vperm.xlu0 %3550, %v2841_v7  }
 0x3fe   : > { %v2295_v47 = vpop.permute.xlu1 %2294 }
 0x400   : > { %v2297_v58 = vpop.permute.xlu0 %2296 }
 0x401   : > { %v2304_v52 = vsel %vm747_vm0, %v2295_v47, %v2297_v58 }
 0x402   : > { %v2299_v2 = vpop.permute.xlu1 %2298  ;;  %v2306_v41 = vmul.f32 %v3558_v42, %v2304_v52 }
 0x403   : > { %v2303_v60 = vsel %vm747_vm0, %v2297_v58, %v2299_v2 }
 0x404   : > { %v2307_v27 = vmul.f32 %v3559_v3, %v2303_v60  ;;  %v2301_v21 = vpop.permute.xlu0 %2300 }
 0x405   : > { %v2302_v24 = vsel %vm747_vm0, %v2299_v2, %v2301_v21  ;;  %v2305_v25 = vsel %vm747_vm0, %v2301_v21, %v2295_v47  ;;  %v5006_v21 = vld [vmem:[#allocation24_spill] sm:$0xff] }
 0x406   : > { %v3417_v26 = vpack.c.bf16 %v2307_v27, %v2306_v41  ;;  %v2308_v49 = vmul.f32 %v3560_v54, %v2302_v24  ;;  %v2309_v39 = vmul.f32 %v3561_v43, %v2305_v25  ;;  %v2227_v40 = vpop.permute.xlu1 %2226  ;;  %v5007_v25 = vld [vmem:[#allocation23_spill] sm:$0xff] }
 0x408   : > { %v3335_v13 = vcombine.low %v3417_v26, %v5005_v10  ;;  %v3418_v44 = vpack.c.bf16 %v2309_v39, %v2308_v49  ;;  %v2229_v59 = vpop.permute.xlu0 %2228  ;;  %v3336_v51 = vcombine.high %v3417_v26, %v5005_v10 }
 0x409   : > { %v2236_v31 = vsel %vm677_vm2, %v2227_v40, %v2229_v59 }
 0x40a   : > { %v3337_v19 = vcombine.low %v3418_v44, %v5005_v10  ;;  %2748 = vmatprep.subr.bf16.mxu0 %v3336_v51  ;;  %v2231_v32 = vpop.permute.xlu1 %2230  ;;  %v3338_v55 = vcombine.high %v3418_v44, %v5005_v10  ;;  %v2238_v22 = vmul.f32 %v2236_v31, %v4051_v57 }
 0x40b   : > { %2749 = vmatpush2.bf16.msra.mxu0 %v3335_v13  ;;  %v2235_v29 = vsel %vm677_vm2, %v2229_v59, %v2231_v32 }
 0x40c   : > { %v2233_v56 = vpop.permute.xlu0 %2232  ;;  %2789 = vmatprep.subr.bf16.mxu1 %v3338_v55  ;;  %v2239_v20 = vmul.f32 %v2235_v29, %v4027_v46 }
 0x40d   : > { %2790 = vmatpush2.bf16.msra.mxu1 %v3337_v19  ;;  %v2234_v34 = vsel %vm677_vm2, %v2231_v32, %v2233_v56  ;;  %v2237_v63 = vsel %vm677_vm2, %v2233_v56, %v2227_v40  ;;  %v5008_v32 = vld [vmem:[#allocation25_spill] sm:$0xff]  ;;  %v5009_v56 = vld [vmem:[#allocation26_spill] sm:$0xff] }
 0x40e   : > { %v2261_v6 = vpop.permute.xlu1 %2260  ;;  %v2240_v1 = vmul.f32 %v2234_v34, %v4032_v50 }
 0x410   : > { %v2263_v15 = vpop.permute.xlu0 %2262 }
 0x411   : > { %v2270_v30 = vsel %vm712_vm1, %v2261_v6, %v2263_v15 }
 0x412   : > { %v2265_v62 = vpop.permute.xlu1 %2264  ;;  %v2272_v8 = vmul.f32 %v2270_v30, %v5002_v5  ;;  %v2241_v5 = vmul.f32 %v2237_v63, %v4024_v45 }
 0x413   : > { %v2269_v9 = vsel %vm712_vm1, %v2263_v15, %v2265_v62 }
 0x414   : > { %v2273_v36 = vmul.f32 %v2269_v9, %v4998_v4  ;;  %v2267_v61 = vpop.permute.xlu0 %2266  ;;  %v3470_v4 = vpack.c.bf16 %v2272_v8, %v2238_v22  ;;  %v5010_v8 = vld [vmem:[#allocation31_spill] sm:$0xff] }
 0x415   : > { %v2268_v17 = vsel %vm712_vm1, %v2265_v62, %v2267_v61  ;;  %v2271_v7 = vsel %vm712_vm1, %v2267_v61, %v2261_v6  ;;  %v5011_v61 = vld [vmem:[#allocation27_spill] sm:$0xff] }
 0x416   : > { %v2274_v47 = vmul.f32 %v2268_v17, %v5003_v35  ;;  %v2275_v58 = vmul.f32 %v2271_v7, %v4999_v12  ;;  %v2193_v46 = vpop.permute.xlu1 %2192  ;;  %v3471_v52 = vpack.c.bf16 %v2273_v36, %v2239_v20  ;;  %v5013_v7 = vld [vmem:[#allocation30_spill] sm:$0xff] }
 0x418   : > { %v3472_v2 = vpack.c.bf16 %v2274_v47, %v2240_v1  ;;  %v2195_v60 = vpop.permute.xlu0 %2194  ;;  %2750 = vmatprep.subr.bf16.mxu0 %v3471_v52  ;;  %v3473_v57 = vpack.c.bf16 %v2275_v58, %v2241_v5  ;;  %v5012_v1 = vld [vmem:[#allocation29_spill] sm:$0xff]  ;;  %v5014_v47 = vld [vmem:[#allocation32_spill] sm:$0xff] }
 0x419   : > { %v2202_v50 = vsel %vm642_vm3, %v2193_v46, %v2195_v60  ;;  %2751 = vmatpush2.bf16.msra.mxu0 %v3470_v4  ;;  %v5015_v52 = vld [vmem:[#allocation28_spill] sm:$0xff] }
 0x41a   : > { %2791 = vmatprep.subr.bf16.mxu1 %v3473_v57  ;;  %v2197_v42 = vpop.permute.xlu1 %2196  ;;  %v2204_v41 = vmul.f32 %v2202_v50, %v4080_v33 }
 0x41b   : > { %v2201_v45 = vsel %vm642_vm3, %v2195_v60, %v2197_v42  ;;  %2792 = vmatpush2.bf16.msra.mxu1 %v3472_v2 }
 0x41c   : > { %v2205_v35 = vmul.f32 %v2201_v45, %v4092_v37  ;;  %v2199_v12 = vpop.permute.xlu0 %2198  ;;  %v3466_v49 = vpack.c.bf16 %v2204_v41, %v4619_v38 }
 0x41d   : > { %v2200_v3 = vsel %vm642_vm3, %v2197_v42, %v2199_v12  ;;  %v2203_v27 = vsel %vm642_vm3, %v2199_v12, %v2193_v46 }
 0x41e   : > { %v2206_v24 = vmul.f32 %v2200_v3, %v5006_v21  ;;  %v2207_v26 = vmul.f32 %v2203_v27, %v5007_v25  ;;  %v2123_v54 = vpop.permute.xlu1 %2122  ;;  %v3467_v33 = vpack.c.bf16 %v2205_v35, %v4621_v18  ;;  %v5016_v27 = vld [vmem:[#allocation34_spill] sm:$0xff] }
 0x420   : > { %v3468_v43 = vpack.c.bf16 %v2206_v24, %v4625_v48  ;;  %v2125_v39 = vpop.permute.xlu0 %2124  ;;  %2752 = vmatprep.subr.bf16.mxu0 %v3467_v33  ;;  %v3469_v37 = vpack.c.bf16 %v2207_v26, %v4629_v53  ;;  %v5017_v24 = vld [vmem:[#allocation35_spill] sm:$0xff] }
 0x421   : > { %2753 = vmatpush2.bf16.msra.mxu0 %v3466_v49  ;;  %v2132_v59 = vsel %vm570_vm4, %v2123_v54, %v2125_v39 }
 0x422   : > { %2793 = vmatprep.subr.bf16.mxu1 %v3469_v37  ;;  %v2127_v40 = vpop.permute.xlu1 %2126  ;;  %v2135_v55 = vmul.f32 %v2132_v59, %v5008_v32  ;;  %v5020_v32 = vld [vmem:[#allocation38_spill] sm:$0xff] }
 0x423   : > { %2794 = vmatpush2.bf16.msra.mxu1 %v3468_v43  ;;  %v2131_v34 = vsel %vm570_vm4, %v2125_v39, %v2127_v40 }
 0x424   : > { %v2129_v13 = vpop.permute.xlu0 %2128  ;;  %v2136_v4 = vmul.f32 %v2131_v34, %v5015_v52 }
 0x425   : > { %v2130_v29 = vsel %vm570_vm4, %v2127_v40, %v2129_v13  ;;  %v2133_v30 = vsel %vm570_vm4, %v2129_v13, %v2123_v54  ;;  %v5018_v40 = vld [vmem:[#allocation40_spill] sm:$0xff] }
 0x426   : > { %v2157_v44 = vpop.permute.xlu1 %2156  ;;  %v2134_v22 = vmul.f32 %v2133_v30, %v5011_v61  ;;  %v2137_v17 = vmul.f32 %v2130_v29, %v5012_v1  ;;  %v5023_v30 = vld [vmem:[#allocation37_spill] sm:$0xff] }
 0x428   : > { %v2159_v51 = vpop.permute.xlu0 %2158 }
 0x429   : > { %v2166_v19 = vsel %vm605_vm5, %v2157_v44, %v2159_v51 }
 0x42a   : > { %v2169_v6 = vmul.f32 %v2166_v19, %v5009_v56  ;;  %v2161_v15 = vpop.permute.xlu1 %2160  ;;  %v5021_v56 = vld [vmem:[#allocation39_spill] sm:$0xff] }
 0x42b   : > { %v2165_v31 = vsel %vm605_vm5, %v2159_v51, %v2161_v15  ;;  %v5019_v51 = vld [vmem:[#allocation36_spill] sm:$0xff] }
 0x42c   : > { %v2163_v62 = vpop.permute.xlu0 %2162  ;;  %v3463_v63 = vpack.c.bf16 %v2169_v6, %v2135_v55  ;;  %v2170_v9 = vmul.f32 %v2165_v31, %v5010_v8 }
 0x42d   : > { %v2164_v20 = vsel %vm605_vm5, %v2161_v15, %v2163_v62  ;;  %v2167_v36 = vsel %vm605_vm5, %v2163_v62, %v2157_v44  ;;  %v5022_v15 = vld [vmem:[#allocation41_spill] sm:$0xff] }
 0x42e   : > { %v2168_v5 = vmul.f32 %v2167_v36, %v5013_v7  ;;  %v2171_v58 = vmul.f32 %v2164_v20, %v5014_v47  ;;  %2754 = vmatprep.subr.bf16.mxu0 %v3463_v63  ;;  %v2055_v46 = vpop.permute.xlu1 %2054  ;;  %v3464_v50 = vpack.c.bf16 %v2170_v9, %v2136_v4 }
 0x430   : > { %v3462_v2 = vpack.c.bf16 %v2168_v5, %v2134_v22  ;;  %v2057_v60 = vpop.permute.xlu0 %2056  ;;  %v3465_v57 = vpack.c.bf16 %v2171_v58, %v2137_v17 }
 0x431   : > { %v2064_v35 = vsel %vm500_vm6, %v2055_v46, %v2057_v60 }
 0x432   : > { %2755 = vmatpush2.bf16.msra.mxu0 %v3462_v2  ;;  %2795 = vmatprep.subr.bf16.mxu1 %v3465_v57  ;;  %v2059_v42 = vpop.permute.xlu1 %2058  ;;  %v2067_v21 = vmul.f32 %v2064_v35, %v5016_v27  ;;  %v3562_v2 = vld [vmem:[%s3852_s5 + $0x8] sm:$0xff] }
 0x433   : > { %2796 = vmatpush2.bf16.msra.mxu1 %v3464_v50  ;;  %v2063_v43 = vsel %vm500_vm6, %v2057_v60, %v2059_v42  ;;  %v5024_v60 = vld [vmem:[#allocation48_spill] sm:$0xff] }
 0x434   : > { %v2061_v41 = vpop.permute.xlu0 %2060  ;;  %v2068_v31 = vmul.f32 %v2063_v43, %v5023_v30  ;;  %v3475_v57 = vpack.c.bf16 %v5024_v60, %v3562_v2  ;;  %v3563_v50 = vld [vmem:[%s3852_s5 + $0x18] sm:$0xff] }
 0x435   : > { %v2062_v54 = vsel %vm500_vm6, %v2059_v42, %v2061_v41  ;;  %v2065_v33 = vsel %vm500_vm6, %v2061_v41, %v2055_v46  ;;  %v5025_v42 = vld [vmem:[#allocation49_spill] sm:$0xff] }
 0x436   : > { %v2089_v45 = vpop.permute.xlu1 %2088  ;;  %v2066_v19 = vmul.f32 %v2065_v33, %v5019_v51  ;;  %v2069_v55 = vmul.f32 %v2062_v54, %v5020_v32  ;;  %v3477_v41 = vpack.c.bf16 %v5025_v42, %v3563_v50 }
 0x438   : > { %v2091_v12 = vpop.permute.xlu0 %2090 }
 0x439   : > { %v2098_v3 = vsel %vm535_vm7, %v2089_v45, %v2091_v12 }
 0x43a   : > { %v2101_v25 = vmul.f32 %v2098_v3, %v5017_v24  ;;  %v2093_v26 = vpop.permute.xlu1 %2092 }
 0x43b   : > { %v2097_v49 = vsel %vm535_vm7, %v2091_v12, %v2093_v26  ;;  %v5027_v12 = vld [vmem:[#allocation47_spill] sm:$0xff] }
 0x43c   : > { %v2095_v39 = vpop.permute.xlu0 %2094  ;;  %v3459_v37 = vpack.c.bf16 %v2101_v25, %v2067_v21  ;;  %v2102_v13 = vmul.f32 %v2097_v49, %v5018_v40 }
 0x43d   : > { %v2096_v44 = vsel %vm535_vm7, %v2093_v26, %v2095_v39  ;;  %v2099_v59 = vsel %vm535_vm7, %v2095_v39, %v2089_v45  ;;  %v5026_v45 = vld [vmem:[#allocation46_spill] sm:$0xff] }
 0x43e   : > { %v2100_v6 = vmul.f32 %v2099_v59, %v5021_v56  ;;  %v2103_v29 = vmul.f32 %v2096_v44, %v5022_v15  ;;  %2756 = vmatprep.subr.bf16.mxu0 %v3459_v37  ;;  %v3460_v63 = vpack.c.bf16 %v2102_v13, %v2068_v31 }
 0x440   : > { %v3458_v34 = vpack.c.bf16 %v2100_v6, %v2066_v19  ;;  %v3461_v62 = vpack.c.bf16 %v2103_v29, %v2069_v55 }
 0x442   : > { %2757 = vmatpush2.bf16.msra.mxu0 %v3458_v34  ;;  %2797 = vmatprep.subr.bf16.mxu1 %v3461_v62 }
 0x443   : > { %2758 = vmatprep.subr.bf16.mxu0 %v4561_v14  ;;  %2798 = vmatpush2.bf16.msra.mxu1 %v3460_v63 }
 0x444   : > { %2799 = vmatprep.subr.bf16.mxu1 %v4565_v16 }
 0x446   : > { %2759 = vmatpush2.bf16.msra.mxu0 %v4570_v0 }
 0x447   : > { %2800 = vmatpush2.bf16.msra.mxu1 %v4573_v28  ;;  %v2399_v8 = vpop.permute.xlu1 %2398 }
 0x449   : > { %2761 = vmatmul.mubr.bf16.vlgmr.msra.gmra.mxu0 %v3281_v11  ;;  %v2845_v3 = vpop.permute.xlu0 %2844 }
 0x44a   : > { %2802 = vmatmul.mubr.bf16.vlgmr.msra.gmra.mxu1 %v3281_v11  ;;  %2923 = vmatprep.mubr.bf16.mxu0 %v5005_v10 }
 0x44b   : > { %2964 = vmatprep.mubr.bf16.mxu1 %v5005_v10 }
 0x509   : > { %v2762_v9 = vpop.f32.mrf.mxu0 }
 0x50a   : > { %v2763_v20 = vadd.f32 %v2762_v9, %v2399_v8  ;;  %v2803_v14 = vpop.f32.mrf.mxu1 }
 0x50b   : > { %v2804_v36 = vadd.f32 %v2803_v14, %v2399_v8  ;;  %v2764_v61 = vpop.f32.mrf.mxu0 }
 0x50c   : > { %v2765_v16 = vadd.f32 %v2764_v61, %v2399_v8  ;;  %v2805_v22 = vpop.f32.mrf.mxu1  ;;  %v2810_v23 = vmax.f32 %v2763_v20, 0.0 }
 0x50d   : > { %v2806_v1 = vadd.f32 %v2805_v22, %v2399_v8  ;;  %v2766_v0 = vpop.f32.mrf.mxu0  ;;  %v2812_v28 = vmax.f32 %v2804_v36, 0.0 }
 0x50e   : > { %v2811_v17 = vmax.f32 %v2765_v16, 0.0  ;;  %v2807_v7 = vpop.f32.mrf.mxu1  ;;  %v3478_v46 = vpack.c.bf16 %v2810_v23, %v4619_v38  ;;  %v3565_v38 = vld [vmem:[%s3852_s5 + $0x10] sm:$0xff] }
 0x50f   : > { %v2813_v5 = vmax.f32 %v2806_v1, 0.0  ;;  %v2767_v47 = vpop.f32.mrf.mxu0  ;;  %v3480_v4 = vpack.c.bf16 %v2812_v28, %v4625_v48  ;;  %v2832_v48 = vld [vmem:[%s4879_s3] sm:$0xf] }
 0x510   : > { %v3479_v10 = vpack.c.bf16 %v2811_v17, %v4621_v18  ;;  %v2808_v58 = vpop.f32.mrf.mxu1  ;;  %v3564_v18 = vld [vmem:[%s3852_s5] sm:$0xff]  ;;  %s3421_s5 = sshll.u32 %s3760_s25, 9  ;;  %s2982_s25 = scalar_lea.sflag [#allocation6], %s3846_s14 }
 0x511   : > { %v3481_v52 = vpack.c.bf16 %v2813_v5, %v4629_v53  ;;  %v3474_v35 = vpack.c.bf16 %v5026_v45, %v3564_v18  ;;  %v3476_v53 = vpack.c.bf16 %v5027_v12, %v3565_v38  ;;  %s4833_s19 = scalar_lea.hbm %s4882_s6, %s3421_s5 }
 0x512   : > { %2903 = vmatprep.subr.bf16.mxu0 %v3479_v10 }
 0x513   : > { %2904 = vmatpush1.bf16.msra.mxu0 %v3478_v46  ;;  %2944 = vmatprep.subr.bf16.mxu1 %v3481_v52 }
 0x514   : > { %2905 = vmatprep.subr.bf16.mxu0 %v3475_v57  ;;  %2945 = vmatpush1.bf16.msra.mxu1 %v3480_v4 }
 0x515   : > { %2946 = vmatprep.subr.bf16.mxu1 %v3477_v41 }
 0x517   : > { %2906 = vmatpush1.bf16.msra.mxu0 %v3474_v35 }
 0x518   : > { %2947 = vmatpush1.bf16.msra.mxu1 %v3476_v53 }
 0x51a   : > { %3357 = vmatmul.mubr.msk.bf16.vlgmr.msra.gmra.mxu0 %vm2887_vm8, %v2832_v48 }
 0x51b   : > { %3358 = vmatmul.mubr.msk.bf16.vlgmr.msra.gmra.mxu1 %vm2887_vm8, %v2832_v48 }
 0x5da   : > { %v2925_v27 = vpop.f32.mrf.mxu0 }
 0x5db   : > { %v2926_v21 = vadd.f32 %v2925_v27, %v2845_v3  ;;  %v2966_v24 = vpop.f32.mrf.mxu1 }
 0x5dc   : > { %v2967_v25 = vadd.f32 %v2966_v24, %v2845_v3  ;;  %v2927_v26 = vpop.f32.mrf.mxu0 }
 0x5dd   : > { %v2973_v54 = vadd.f32 %v3564_v18, %v2926_v21  ;;  %v2928_v33 = vadd.f32 %v2927_v26, %v2845_v3  ;;  %v2968_v49 = vpop.f32.mrf.mxu1 }
 0x5de   : > { %v2975_v43 = vadd.f32 %v3565_v38, %v2967_v25  ;;  %v2969_v39 = vadd.f32 %v2968_v49, %v2845_v3  ;;  %v2929_v37 = vpop.f32.mrf.mxu0 }
 0x5df   : > { %2977 = vst [vmem:[%s282_s7] sm:$0xff] %v2973_v54  ;;  %v2974_v40 = vadd.f32 %v3562_v2, %v2928_v33  ;;  %v2970_v13 = vpop.f32.mrf.mxu1 }
 0x5e0   : > { %2979 = vst [vmem:[%s282_s7 + $0x10] sm:$0xff] %v2975_v43  ;;  %v2976_v44 = vadd.f32 %v3563_v50, %v2969_v39  ;;  %v2930_v59 = vpop.f32.mrf.mxu0 }
 0x5e1   : > { %2978 = vst [vmem:[%s282_s7 + $0x8] sm:$0xff] %v2974_v40  ;;  %v2971_v51 = vpop.f32.mrf.mxu1 }
 0x5e2   : > { %2980 = vst [vmem:[%s282_s7 + $0x18] sm:$0xff] %v2976_v44 }
 0x5e3   : > { %3633 = shalt.err (!%p3630_p0)
}
 0x5e4   : > { %s3634_s10 = scalar_lea.hbm %s4833_s19, 512  ;;  %s3638_s13 = scalar_lea.hbm %s4882_s6, 1024 }
 0x5e5   : > { %p3635_p5 = scmp.ne.s32.totalorder %s4833_s19, %s3634_s10  ;;  %p3639_p1 = scmp.lt.s32.totalorder %s4833_s19, %s4882_s6 }
 0x5e6   : > { %p3640_p4 = scmp.lt.s32.totalorder %s3638_s13, %s3634_s10 }
 0x5e7   : > { %p3636_p9 = pnand %p3635_p5, %p5028_p3 }
 0x5e8   : > { %p3641_p6 = por %p3640_p4, %p3639_p1 }
 0x5e9   : > { %p3637_p12 = pneg %p3636_p9 }
 0x5eb   : > { %p3642_p8 = pnand %p3641_p6, %p3637_p12 }
 0x5ed   : > { %3645 = shalt.err (!%p3642_p8)
}
 0x5ee   : > { %3488 = dma.vmem_to_hbm [thread:$0]  (%p5028_p3), %s4835_s16, 512, %s4833_s19, %s2982_s25  }
 0x5ef PF: > { %s3008_s5 = sand.u32 1, %s3676_s21   ;;  %p5029_p11 = scmp.ne.s32.totalorder %s4940_s28, 0 }
 0x5f0   : > { %p5030_p7 = scmp.ge.s32.totalorder %s3688_s24, 2  ;;  %s3009_s7 = scalar_lea.sflag [#allocation6], %s3008_s5 }
 0x5f2   : > { %p3499_p10 = pnand %p5030_p7, %p5029_p11 }
 0x5f4   : > { %p3500_p2 = pneg %p3499_p10 }
 0x5f6   : > { %3671 = dma.done.wait (%p3500_p2), %s3009_s7, 512  }
 0x5f7   : > { %3673 = vsyncadd (%p3500_p2), %s3009_s7, 4294966784  ;;  %p20_p13 = scmp.ge.s32.totalorder %s3793_s9, 4   ;;  %s5031_s21 = smov %s3680_s22 }
 0x5f8   : > { %s5032_s22 = smov %s3684_s23  ;;  %s5033_s23 = smov %s3810_s17 }
 0x5f9   : > { %s5034_s24 = smov %s3793_s9  ;;  %22 = sbr.rel (!%p20_p13) target bundleno = 8 (0x8), region = 97 }
 0x5fe   :  { %3014 = vsyncpa [#allocation5], 1 }
 0x5ff   :  { %3016 = vsyncpa [#allocation5 + $0x1], 1 }
 0x600   :  { %3017 = vsyncpa [#allocation8], 1 }
 0x601   :  { %3018 = vsyncpa [#allocation6], 1 }
 0x602   :  { %3020 = vsyncpa [#allocation6 + $0x1], 1 }

</bundles_post_ra>
